<compile_context>
chip_gen: v7x
topology: tpu7x:2x2x1
jax: 0.10.0
libtpu: 0.0.40
codegen_flags: <defaults>
</compile_context>

<pallas_src>
import jax
import jax.numpy as jnp
from jax.experimental import pallas as pl
from jax.experimental.pallas import tpu as pltpu

# ----------------------------- model dimensions ------------------------------
N_NODES = 128          # number of graph nodes (lane axis of every activation)
NOISE_DIM = 16
GEN_HID_DIMS = [32, 64]
ATTRB_DIM = 32
ED_HID_DIMS = [64, 32]
OUT_DIM = 16
BN_EPS = 1e-5

# --------------------------- static packing layout ---------------------------
# Weights kept in PyTorch orientation (out_features, in_features), stacked
# row-wise (column-padded) into one slab; every row offset is a multiple of 8.
_LINEARS = [
    ("gw0", GEN_HID_DIMS[0], NOISE_DIM),
    ("gw1", GEN_HID_DIMS[1], GEN_HID_DIMS[0]),
    ("gw2", ATTRB_DIM, GEN_HID_DIMS[1]),
    ("dw0", ED_HID_DIMS[0], ATTRB_DIM),
    ("dw1", ED_HID_DIMS[1], ED_HID_DIMS[0]),
    ("dw2", OUT_DIM, ED_HID_DIMS[1]),
]
W_ROW = {}
_row = 0
for _name, _out_f, _in_f in _LINEARS:
    W_ROW[_name] = (_row, _out_f, _in_f)
    _row += _out_f
W_SLAB_ROWS = _row                                   # 240 (multiple of 8)
W_SLAB_COLS = max(i for _, _, i in _LINEARS)         # 64

# Biases / BN gammas / BN betas row-stacked in a single lane-0 column (every
# offset sublane-aligned) -> lane-0 column slices, no cross-lane moves.
_B_ENTRIES = [
    ("gb0", GEN_HID_DIMS[0]), ("gg0", GEN_HID_DIMS[0]), ("gbe0", GEN_HID_DIMS[0]),
    ("gb1", GEN_HID_DIMS[1]), ("gg1", GEN_HID_DIMS[1]), ("gbe1", GEN_HID_DIMS[1]),
    ("gb2", ATTRB_DIM),
    ("db0", ED_HID_DIMS[0]), ("db1", ED_HID_DIMS[1]), ("db2", OUT_DIM),
]
B_ROW = {}
_r = 0
for _n, _sz in _B_ENTRIES:
    B_ROW[_n] = (_r, _sz)
    _r += _sz
B_SLAB_ROWS = _r                                     # 432 (multiple of 8)


# --------------------------------- kernel ------------------------------------
def gaan_kernel(noise_ref, x_ref, w_ref, b_ref, xfake_t_ref, a_ref):
    n = x_ref.shape[1]   # nodes per instance (lane axis)

    def bvec(name):
        row, size = B_ROW[name]
        return b_ref[row:row + size, 0:1]                    # (size, 1) lane-0 col

    def linear(h, wname, bname):
        row, out_f, in_f = W_ROW[wname]
        w = w_ref[row:row + out_f, 0:in_f]                   # (out_f, in_f)
        return jnp.dot(w, h, preferred_element_type=jnp.float32) + bvec(bname)

    def batch_norm(h, out_f, gname, bname):
        # one XLU lane-reduction for both moments: stack [h, h*h] on sublanes
        stats = jnp.mean(jnp.concatenate([h, h * h], axis=0), axis=-1,
                         keepdims=True)                      # (2*out_f, 1)
        m = stats[0:out_f]
        m2 = stats[out_f:2 * out_f]
        inv = jax.lax.rsqrt(m2 - m * m + BN_EPS)             # biased, training mode
        scale = inv * bvec(gname)                            # fold affine on (F,1)
        shift = bvec(bname) - m * scale
        return h * scale + shift                             # 2 tile-wide VPU ops

    def relu(t):
        return jnp.maximum(t, 0.0)

    # ---- generator: Linear -> relu -> BN -> Linear -> relu -> BN -> Linear
    # activations are (features, nodes): features on sublanes, nodes on lanes
    h = relu(linear(noise_ref[...], "gw0", "gb0"))           # (32, n)
    h = batch_norm(h, GEN_HID_DIMS[0], "gg0", "gbe0")
    h = relu(linear(h, "gw1", "gb1"))                        # (64, n)
    h = batch_norm(h, GEN_HID_DIMS[1], "gg1", "gbe1")
    x_fake_t = linear(h, "gw2", "gb2")                       # (ATTRB_DIM, n)
    xfake_t_ref[...] = x_fake_t                              # lane-dense store

    # ---- discriminator (no norm), run once on [x | x_fake]: (ATTRB_DIM, 2n)
    d = jnp.concatenate([x_ref[...], x_fake_t], axis=1)
    d = relu(linear(d, "dw0", "db0"))                        # (64, 2n)
    d = relu(linear(d, "dw1", "db1"))                        # (32, 2n)
    z = linear(d, "dw2", "db2")                              # (OUT_DIM, 2n)

    # ---- fused Gram: one wide MXU issue on the full z, keep diagonal blocks
    g = jax.lax.dot_general(z, z, dimension_numbers=(((0,), (0,)), ((), ())),
                            preferred_element_type=jnp.float32)   # (2n, 2n)
    blocks = jnp.concatenate([g[0:n, 0:n], g[n:2 * n, n:2 * n]], axis=1)  # (n, 2n)
    # sigmoid(x) = 0.5*tanh(0.5*x) + 0.5  -> EUP slot instead of VPU divide
    a_ref[...] = 0.5 * jnp.tanh(0.5 * blocks) + 0.5


# ----------------------------- param packing ----------------------------------
def pack_params(params):
    (gw0, gb0, gg0, gbe0, gw1, gb1, gg1, gbe1, gw2, gb2,
     dw0, db0, dw1, db1, dw2, db2) = params
    weights = {"gw0": gw0, "gw1": gw1, "gw2": gw2,
               "dw0": dw0, "dw1": dw1, "dw2": dw2}
    biases = {"gb0": gb0, "gg0": gg0, "gbe0": gbe0,
              "gb1": gb1, "gg1": gg1, "gbe1": gbe1, "gb2": gb2,
              "db0": db0, "db1": db1, "db2": db2}

    w_parts = []
    for name, out_f, in_f in _LINEARS:
        w_parts.append(jnp.pad(weights[name], ((0, 0), (0, W_SLAB_COLS - in_f))))
    w_slab = jnp.concatenate(w_parts, axis=0).astype(jnp.float32)     # (240, 64)

    b_slab = jnp.concatenate(
        [biases[name].reshape(-1, 1) for name, _ in _B_ENTRIES],
        axis=0).astype(jnp.float32)                                   # (432, 1)
    return w_slab, b_slab


# ------------------------------- wrapper --------------------------------------
@jax.jit
def gaan_forward(random_noise, x, w_slab, b_slab):
    """random_noise: (B, N, NOISE_DIM); x: (B, N, ATTRB_DIM)."""
    B, n, _ = random_noise.shape

    # layout plumbing to lane-dense (features, nodes) per instance
    noise_t = jnp.swapaxes(random_noise, 1, 2)   # (B, NOISE_DIM, n)
    x_t = jnp.swapaxes(x, 1, 2)                  # (B, ATTRB_DIM, n)

    flops_per = (2 * (32 * 16 + 64 * 32 + 32 * 64) * n          # generator
                 + 2 * (64 * 32 + 32 * 64 + 16 * 32) * 2 * n    # discriminator
                 + 2 * (2 * n) * (2 * n) * OUT_DIM)             # fused gram
    trans_per = n * 2 * n + 2 * (GEN_HID_DIMS[0] + GEN_HID_DIMS[1])
    bytes_per = 4 * (NOISE_DIM * n + ATTRB_DIM * n              # inputs
                     + ATTRB_DIM * n + n * 2 * n)               # outputs
    param_bytes = 4 * (W_SLAB_ROWS * W_SLAB_COLS + B_SLAB_ROWS)

    xfake_t, a_both = pl.pallas_call(
        gaan_kernel,
        out_shape=(
            jax.ShapeDtypeStruct((B, ATTRB_DIM, n), jnp.float32),  # x_fake^T
            jax.ShapeDtypeStruct((B, n, 2 * n), jnp.float32),      # [a | a_fake]
        ),
        grid=(B,),
        in_specs=[
            pl.BlockSpec((None, NOISE_DIM, n), lambda b: (b, 0, 0)),
            pl.BlockSpec((None, ATTRB_DIM, n), lambda b: (b, 0, 0)),
            pl.BlockSpec((W_SLAB_ROWS, W_SLAB_COLS), lambda b: (0, 0)),
            pl.BlockSpec((B_SLAB_ROWS, 1), lambda b: (0, 0)),
        ],
        out_specs=(
            pl.BlockSpec((None, ATTRB_DIM, n), lambda b: (b, 0, 0)),
            pl.BlockSpec((None, n, 2 * n), lambda b: (b, 0, 0)),
        ),
        compiler_params=pltpu.CompilerParams(
            dimension_semantics=("parallel",)),     # v7x: shard instances on 2 TCs
        cost_estimate=pl.CostEstimate(
            flops=B * flops_per,
            transcendentals=B * trans_per,
            bytes_accessed=B * bytes_per + param_bytes),
    )(noise_t, x_t, w_slab, b_slab)

    # back to the PyTorch-facing (N, attrb_dim) orientation; split merged output
    x_fake = jnp.swapaxes(xfake_t, 1, 2)
    a = a_both[:, :, 0:n]
    a_fake = a_both[:, :, n:2 * n]
    return x_fake, a, a_fake


# -------------------------- deterministic params ------------------------------
def init_linear(key, fan_in, fan_out):
    kw, kb = jax.random.split(key)
    bound = 1.0 / (fan_in ** 0.5)
    # PyTorch orientation: weight (out, in), bias (out,)
    w = jax.random.uniform(kw, (fan_out, fan_in), jnp.float32, -bound, bound)
    b = jax.random.uniform(kb, (fan_out,), jnp.float32, -bound, bound)
    return w, b


def init_params(key):
    keys = jax.random.split(key, 6)
    gw0, gb0 = init_linear(keys[0], NOISE_DIM, GEN_HID_DIMS[0])
    gw1, gb1 = init_linear(keys[1], GEN_HID_DIMS[0], GEN_HID_DIMS[1])
    gw2, gb2 = init_linear(keys[2], GEN_HID_DIMS[1], ATTRB_DIM)
    gg0 = jnp.ones((GEN_HID_DIMS[0],), jnp.float32)    # BN gamma
    gbe0 = jnp.zeros((GEN_HID_DIMS[0],), jnp.float32)  # BN beta
    gg1 = jnp.ones((GEN_HID_DIMS[1],), jnp.float32)
    gbe1 = jnp.zeros((GEN_HID_DIMS[1],), jnp.float32)
    dw0, db0 = init_linear(keys[3], ATTRB_DIM, ED_HID_DIMS[0])
    dw1, db1 = init_linear(keys[4], ED_HID_DIMS[0], ED_HID_DIMS[1])
    dw2, db2 = init_linear(keys[5], ED_HID_DIMS[1], OUT_DIM)
    return (gw0, gb0, gg0, gbe0, gw1, gb1, gg1, gbe1, gw2, gb2,
            dw0, db0, dw1, db1, dw2, db2)


# ------------------------------ reference (JAX) --------------------------------
def gaan_reference(random_noise, x, params):
    (gw0, gb0, gg0, gbe0, gw1, gb1, gg1, gbe1, gw2, gb2,
     dw0, db0, dw1, db1, dw2, db2) = params

    def lin(h, w, b):
        return h @ w.T + b

    def bn(h, g, b):
        mean = h.mean(0, keepdims=True)
        var = ((h - mean) ** 2).mean(0, keepdims=True)  # biased, training mode
        return (h - mean) / jnp.sqrt(var + BN_EPS) * g + b

    h = lin(random_noise, gw0, gb0)
    h = bn(jnp.maximum(h, 0.0), gg0, gbe0)
    h = lin(h, gw1, gb1)
    h = bn(jnp.maximum(h, 0.0), gg1, gbe1)
    x_fake = lin(h, gw2, gb2)

    def disc(t):
        t = jnp.maximum(lin(t, dw0, db0), 0.0)
        t = jnp.maximum(lin(t, dw1, db1), 0.0)
        return lin(t, dw2, db2)

    z = disc(x)
    z_ = disc(x_fake)
    return x_fake, jax.nn.sigmoid(z @ z.T), jax.nn.sigmoid(z_ @ z_.T)


# --------------------------------- main ---------------------------------------
if __name__ == "__main__":
    key = jax.random.PRNGKey(0)
    k_noise, k_x, k_params = jax.random.split(key, 3)

    B = 4  # batch of graph instances amortized over one pallas_call grid
    random_noise = jax.random.normal(k_noise, (B, N_NODES, NOISE_DIM), jnp.float32)
    x = jax.random.normal(k_x, (B, N_NODES, ATTRB_DIM), jnp.float32)
    params = init_params(k_params)
    w_slab, b_slab = pack_params(params)

    x_fake, a, a_fake = gaan_forward(random_noise, x, w_slab, b_slab)
    jax.block_until_ready((x_fake, a, a_fake))

    # sanity check every instance against the pure-JAX reference
    for i in range(B):
        rx, ra, ra_ = gaan_reference(random_noise[i], x[i], params)
        assert jnp.allclose(x_fake[i], rx, atol=1e-4, rtol=1e-4)
        assert jnp.allclose(a[i], ra, atol=1e-4, rtol=1e-4)
        assert jnp.allclose(a_fake[i], ra_, atol=1e-4, rtol=1e-4)

    print("KERNEL_OK")
</pallas_src>

<mosaic_0001>
module attributes {stable_mosaic.version = 11 : i64} {
  func.func @gaan_kernel(%arg0: i32, %arg1: memref<1x16x128xf32, #tpu.memory_space<vmem>>, %arg2: memref<1x32x128xf32, #tpu.memory_space<vmem>>, %arg3: memref<240x64xf32, #tpu.memory_space<vmem>>, %arg4: memref<432x1xf32, #tpu.memory_space<vmem>>, %arg5: memref<1x32x128xf32, #tpu.memory_space<vmem>>, %arg6: memref<1x128x256xf32, #tpu.memory_space<vmem>>) attributes {dimension_semantics = [#tpu.dimension_semantics<parallel>], iteration_bounds = array<i64: 4>, scalar_prefetch = 0 : i64, scratch_operands = 0 : i64, tpu.core_type = #tpu.core_type<tc>, window_params = [{transform_indices = @transform_0, window_bounds = array<i64: 1, 16, 128>}, {transform_indices = @transform_1, window_bounds = array<i64: 1, 32, 128>}, {pipeline_mode = #tpu.pipeline_mode<synchronous>, transform_indices = @transform_2, window_bounds = array<i64: 240, 64>}, {pipeline_mode = #tpu.pipeline_mode<synchronous>, transform_indices = @transform_3, window_bounds = array<i64: 432, 1>}, {transform_indices = @transform_4, window_bounds = array<i64: 1, 32, 128>}, {transform_indices = @transform_5, window_bounds = array<i64: 1, 128, 256>}]} {
    %c0 = arith.constant 0 : index
    %c0_0 = arith.constant 0 : index
    %c0_1 = arith.constant 0 : index
    %0 = vector.load %arg1[%c0, %c0_0, %c0_1] : memref<1x16x128xf32, #tpu.memory_space<vmem>>, vector<1x16x128xf32>
    %1 = vector.shape_cast %0 : vector<1x16x128xf32> to vector<16x128xf32>
    %c0_2 = arith.constant 0 : index
    %c0_3 = arith.constant 0 : index
    %2 = vector.load %arg3[%c0_2, %c0_3] : memref<240x64xf32, #tpu.memory_space<vmem>>, vector<32x16xf32>
    %cst = arith.constant dense<0.000000e+00> : vector<32x128xf32>
    %3 = tpu.matmul %2, %1, %cst {dimension_numbers = #tpu.dot_dimension_numbers<[1], [0], [0], [1], [0, 0, 1, 1], [], []>} : vector<32x16xf32>, vector<16x128xf32>, vector<32x128xf32> -> vector<32x128xf32>
    %c0_4 = arith.constant 0 : index
    %c0_5 = arith.constant 0 : index
    %4 = vector.load %arg4[%c0_4, %c0_5] : memref<432x1xf32, #tpu.memory_space<vmem>>, vector<32x1xf32>
    %5 = vector.broadcast %4 : vector<32x1xf32> to vector<32x128xf32>
    %6 = arith.addf %3, %5 : vector<32x128xf32>
    %cst_6 = arith.constant 0.000000e+00 : f32
    %7 = vector.broadcast %cst_6 : f32 to vector<32x128xf32>
    %8 = arith.maximumf %6, %7 : vector<32x128xf32>
    %9 = arith.mulf %8, %8 : vector<32x128xf32>
    %10 = tpu.concatenate %8, %9 in 0 : vector<32x128xf32>, vector<32x128xf32> -> vector<64x128xf32>
    %cst_7 = arith.constant dense<0.000000e+00> : vector<64xf32>
    %11 = vector.multi_reduction <add>, %10, %cst_7 [1] : vector<64x128xf32> to vector<64xf32>
    %12 = vector.shape_cast %11 : vector<64xf32> to vector<64x1xf32>
    %cst_8 = arith.constant 1.280000e+02 : f32
    %13 = vector.broadcast %cst_8 : f32 to vector<64x1xf32>
    %14 = arith.divf %12, %13 : vector<64x1xf32>
    %15 = vector.extract_strided_slice %14 {offsets = [0, 0], sizes = [32, 1], strides = [1, 1]} : vector<64x1xf32> to vector<32x1xf32>
    %16 = vector.extract_strided_slice %14 {offsets = [32, 0], sizes = [32, 1], strides = [1, 1]} : vector<64x1xf32> to vector<32x1xf32>
    %17 = arith.mulf %15, %15 : vector<32x1xf32>
    %18 = arith.subf %16, %17 : vector<32x1xf32>
    %cst_9 = arith.constant 9.99999974E-6 : f32
    %19 = vector.broadcast %cst_9 : f32 to vector<32x1xf32>
    %20 = arith.addf %18, %19 : vector<32x1xf32>
    %21 = math.rsqrt %20 : vector<32x1xf32>
    %c32 = arith.constant 32 : index
    %c0_10 = arith.constant 0 : index
    %22 = vector.load %arg4[%c32, %c0_10] : memref<432x1xf32, #tpu.memory_space<vmem>>, vector<32x1xf32>
    %23 = arith.mulf %21, %22 : vector<32x1xf32>
    %c64 = arith.constant 64 : index
    %c0_11 = arith.constant 0 : index
    %24 = vector.load %arg4[%c64, %c0_11] : memref<432x1xf32, #tpu.memory_space<vmem>>, vector<32x1xf32>
    %25 = arith.mulf %15, %23 : vector<32x1xf32>
    %26 = arith.subf %24, %25 : vector<32x1xf32>
    %27 = vector.broadcast %23 : vector<32x1xf32> to vector<32x128xf32>
    %28 = arith.mulf %8, %27 : vector<32x128xf32>
    %29 = vector.broadcast %26 : vector<32x1xf32> to vector<32x128xf32>
    %30 = arith.addf %28, %29 : vector<32x128xf32>
    %c32_12 = arith.constant 32 : index
    %c0_13 = arith.constant 0 : index
    %31 = vector.load %arg3[%c32_12, %c0_13] : memref<240x64xf32, #tpu.memory_space<vmem>>, vector<64x32xf32>
    %cst_14 = arith.constant dense<0.000000e+00> : vector<64x128xf32>
    %32 = tpu.matmul %31, %30, %cst_14 {dimension_numbers = #tpu.dot_dimension_numbers<[1], [0], [0], [1], [0, 0, 1, 1], [], []>} : vector<64x32xf32>, vector<32x128xf32>, vector<64x128xf32> -> vector<64x128xf32>
    %c96 = arith.constant 96 : index
    %c0_15 = arith.constant 0 : index
    %33 = vector.load %arg4[%c96, %c0_15] : memref<432x1xf32, #tpu.memory_space<vmem>>, vector<64x1xf32>
    %34 = vector.broadcast %33 : vector<64x1xf32> to vector<64x128xf32>
    %35 = arith.addf %32, %34 : vector<64x128xf32>
    %cst_16 = arith.constant 0.000000e+00 : f32
    %36 = vector.broadcast %cst_16 : f32 to vector<64x128xf32>
    %37 = arith.maximumf %35, %36 : vector<64x128xf32>
    %38 = arith.mulf %37, %37 : vector<64x128xf32>
    %39 = tpu.concatenate %37, %38 in 0 : vector<64x128xf32>, vector<64x128xf32> -> vector<128x128xf32>
    %cst_17 = arith.constant dense<0.000000e+00> : vector<128xf32>
    %40 = vector.multi_reduction <add>, %39, %cst_17 [1] : vector<128x128xf32> to vector<128xf32>
    %41 = vector.shape_cast %40 : vector<128xf32> to vector<128x1xf32>
    %cst_18 = arith.constant 1.280000e+02 : f32
    %42 = vector.broadcast %cst_18 : f32 to vector<128x1xf32>
    %43 = arith.divf %41, %42 : vector<128x1xf32>
    %44 = vector.extract_strided_slice %43 {offsets = [0, 0], sizes = [64, 1], strides = [1, 1]} : vector<128x1xf32> to vector<64x1xf32>
    %45 = vector.extract_strided_slice %43 {offsets = [64, 0], sizes = [64, 1], strides = [1, 1]} : vector<128x1xf32> to vector<64x1xf32>
    %46 = arith.mulf %44, %44 : vector<64x1xf32>
    %47 = arith.subf %45, %46 : vector<64x1xf32>
    %cst_19 = arith.constant 9.99999974E-6 : f32
    %48 = vector.broadcast %cst_19 : f32 to vector<64x1xf32>
    %49 = arith.addf %47, %48 : vector<64x1xf32>
    %50 = math.rsqrt %49 : vector<64x1xf32>
    %c160 = arith.constant 160 : index
    %c0_20 = arith.constant 0 : index
    %51 = vector.load %arg4[%c160, %c0_20] : memref<432x1xf32, #tpu.memory_space<vmem>>, vector<64x1xf32>
    %52 = arith.mulf %50, %51 : vector<64x1xf32>
    %c224 = arith.constant 224 : index
    %c0_21 = arith.constant 0 : index
    %53 = vector.load %arg4[%c224, %c0_21] : memref<432x1xf32, #tpu.memory_space<vmem>>, vector<64x1xf32>
    %54 = arith.mulf %44, %52 : vector<64x1xf32>
    %55 = arith.subf %53, %54 : vector<64x1xf32>
    %56 = vector.broadcast %52 : vector<64x1xf32> to vector<64x128xf32>
    %57 = arith.mulf %37, %56 : vector<64x128xf32>
    %58 = vector.broadcast %55 : vector<64x1xf32> to vector<64x128xf32>
    %59 = arith.addf %57, %58 : vector<64x128xf32>
    %c96_22 = arith.constant 96 : index
    %c0_23 = arith.constant 0 : index
    %60 = vector.load %arg3[%c96_22, %c0_23] : memref<240x64xf32, #tpu.memory_space<vmem>>, vector<32x64xf32>
    %cst_24 = arith.constant dense<0.000000e+00> : vector<32x128xf32>
    %61 = tpu.matmul %60, %59, %cst_24 {dimension_numbers = #tpu.dot_dimension_numbers<[1], [0], [0], [1], [0, 0, 1, 1], [], []>} : vector<32x64xf32>, vector<64x128xf32>, vector<32x128xf32> -> vector<32x128xf32>
    %c288 = arith.constant 288 : index
    %c0_25 = arith.constant 0 : index
    %62 = vector.load %arg4[%c288, %c0_25] : memref<432x1xf32, #tpu.memory_space<vmem>>, vector<32x1xf32>
    %63 = vector.broadcast %62 : vector<32x1xf32> to vector<32x128xf32>
    %64 = arith.addf %61, %63 : vector<32x128xf32>
    %c0_26 = arith.constant 0 : index
    %c0_27 = arith.constant 0 : index
    %c0_28 = arith.constant 0 : index
    %65 = vector.load %arg5[%c0_26, %c0_27, %c0_28] : memref<1x32x128xf32, #tpu.memory_space<vmem>>, vector<1x32x128xf32>
    %66 = vector.shape_cast %65 : vector<1x32x128xf32> to vector<32x128xf32>
    %67 = vector.shape_cast %64 : vector<32x128xf32> to vector<1x32x128xf32>
    tpu.vector_store %arg5[%c0_26, %c0_27, %c0_28], %67 {strides = array<i32>} : memref<1x32x128xf32, #tpu.memory_space<vmem>>, vector<1x32x128xf32>,
    %c0_29 = arith.constant 0 : index
    %c0_30 = arith.constant 0 : index
    %c0_31 = arith.constant 0 : index
    %68 = vector.load %arg2[%c0_29, %c0_30, %c0_31] : memref<1x32x128xf32, #tpu.memory_space<vmem>>, vector<1x32x128xf32>
    %69 = vector.shape_cast %68 : vector<1x32x128xf32> to vector<32x128xf32>
    %70 = tpu.concatenate %69, %64 in 1 : vector<32x128xf32>, vector<32x128xf32> -> vector<32x256xf32>
    %c128 = arith.constant 128 : index
    %c0_32 = arith.constant 0 : index
    %71 = vector.load %arg3[%c128, %c0_32] : memref<240x64xf32, #tpu.memory_space<vmem>>, vector<64x32xf32>
    %cst_33 = arith.constant dense<0.000000e+00> : vector<64x256xf32>
    %72 = tpu.matmul %71, %70, %cst_33 {dimension_numbers = #tpu.dot_dimension_numbers<[1], [0], [0], [1], [0, 0, 1, 1], [], []>} : vector<64x32xf32>, vector<32x256xf32>, vector<64x256xf32> -> vector<64x256xf32>
    %c320 = arith.constant 320 : index
    %c0_34 = arith.constant 0 : index
    %73 = vector.load %arg4[%c320, %c0_34] : memref<432x1xf32, #tpu.memory_space<vmem>>, vector<64x1xf32>
    %74 = vector.broadcast %73 : vector<64x1xf32> to vector<64x256xf32>
    %75 = arith.addf %72, %74 : vector<64x256xf32>
    %cst_35 = arith.constant 0.000000e+00 : f32
    %76 = vector.broadcast %cst_35 : f32 to vector<64x256xf32>
    %77 = arith.maximumf %75, %76 : vector<64x256xf32>
    %c192 = arith.constant 192 : index
    %c0_36 = arith.constant 0 : index
    %78 = vector.load %arg3[%c192, %c0_36] : memref<240x64xf32, #tpu.memory_space<vmem>>, vector<32x64xf32>
    %cst_37 = arith.constant dense<0.000000e+00> : vector<32x256xf32>
    %79 = tpu.matmul %78, %77, %cst_37 {dimension_numbers = #tpu.dot_dimension_numbers<[1], [0], [0], [1], [0, 0, 1, 1], [], []>} : vector<32x64xf32>, vector<64x256xf32>, vector<32x256xf32> -> vector<32x256xf32>
    %c384 = arith.constant 384 : index
    %c0_38 = arith.constant 0 : index
    %80 = vector.load %arg4[%c384, %c0_38] : memref<432x1xf32, #tpu.memory_space<vmem>>, vector<32x1xf32>
    %81 = vector.broadcast %80 : vector<32x1xf32> to vector<32x256xf32>
    %82 = arith.addf %79, %81 : vector<32x256xf32>
    %cst_39 = arith.constant 0.000000e+00 : f32
    %83 = vector.broadcast %cst_39 : f32 to vector<32x256xf32>
    %84 = arith.maximumf %82, %83 : vector<32x256xf32>
    %c224_40 = arith.constant 224 : index
    %c0_41 = arith.constant 0 : index
    %85 = vector.load %arg3[%c224_40, %c0_41] : memref<240x64xf32, #tpu.memory_space<vmem>>, vector<16x32xf32>
    %cst_42 = arith.constant dense<0.000000e+00> : vector<16x256xf32>
    %86 = tpu.matmul %85, %84, %cst_42 {dimension_numbers = #tpu.dot_dimension_numbers<[1], [0], [0], [1], [0, 0, 1, 1], [], []>} : vector<16x32xf32>, vector<32x256xf32>, vector<16x256xf32> -> vector<16x256xf32>
    %c416 = arith.constant 416 : index
    %c0_43 = arith.constant 0 : index
    %87 = vector.load %arg4[%c416, %c0_43] : memref<432x1xf32, #tpu.memory_space<vmem>>, vector<16x1xf32>
    %88 = vector.broadcast %87 : vector<16x1xf32> to vector<16x256xf32>
    %89 = arith.addf %86, %88 : vector<16x256xf32>
    %cst_44 = arith.constant dense<0.000000e+00> : vector<256x256xf32>
    %90 = tpu.matmul %89, %89, %cst_44 {dimension_numbers = #tpu.dot_dimension_numbers<[0], [0], [1], [1], [0, 1, 1, 1], [], []>} : vector<16x256xf32>, vector<16x256xf32>, vector<256x256xf32> -> vector<256x256xf32>
    %91 = vector.extract_strided_slice %90 {offsets = [0, 0], sizes = [128, 128], strides = [1, 1]} : vector<256x256xf32> to vector<128x128xf32>
    %92 = vector.extract_strided_slice %90 {offsets = [128, 128], sizes = [128, 128], strides = [1, 1]} : vector<256x256xf32> to vector<128x128xf32>
    %93 = tpu.concatenate %91, %92 in 1 : vector<128x128xf32>, vector<128x128xf32> -> vector<128x256xf32>
    %cst_45 = arith.constant 5.000000e-01 : f32
    %94 = vector.broadcast %cst_45 : f32 to vector<128x256xf32>
    %95 = arith.mulf %94, %93 : vector<128x256xf32>
    %96 = math.tanh %95 : vector<128x256xf32>
    %cst_46 = arith.constant 5.000000e-01 : f32
    %97 = vector.broadcast %cst_46 : f32 to vector<128x256xf32>
    %98 = arith.mulf %97, %96 : vector<128x256xf32>
    %cst_47 = arith.constant 5.000000e-01 : f32
    %99 = vector.broadcast %cst_47 : f32 to vector<128x256xf32>
    %100 = arith.addf %98, %99 : vector<128x256xf32>
    %c0_48 = arith.constant 0 : index
    %c0_49 = arith.constant 0 : index
    %c0_50 = arith.constant 0 : index
    %101 = vector.load %arg6[%c0_48, %c0_49, %c0_50] : memref<1x128x256xf32, #tpu.memory_space<vmem>>, vector<1x128x256xf32>
    %102 = vector.shape_cast %101 : vector<1x128x256xf32> to vector<128x256xf32>
    %103 = vector.shape_cast %100 : vector<128x256xf32> to vector<1x128x256xf32>
    tpu.vector_store %arg6[%c0_48, %c0_49, %c0_50], %103 {strides = array<i32>} : memref<1x128x256xf32, #tpu.memory_space<vmem>>, vector<1x128x256xf32>,
    return
  }
  func.func @transform_0(%arg0: i32) -> (i32, i32, i32) {
    %c0_i32 = arith.constant 0 : i32
    %c0_i32_0 = arith.constant 0 : i32
    %c0_i32_1 = arith.constant 0 : i32
    return %arg0, %c0_i32, %c0_i32_0 : i32, i32, i32
  }
  func.func @transform_1(%arg0: i32) -> (i32, i32, i32) {
    %c0_i32 = arith.constant 0 : i32
    %c0_i32_0 = arith.constant 0 : i32
    %c0_i32_1 = arith.constant 0 : i32
    return %arg0, %c0_i32, %c0_i32_0 : i32, i32, i32
  }
  func.func @transform_2(%arg0: i32) -> (i32, i32) {
    %c0_i32 = arith.constant 0 : i32
    %c0_i32_0 = arith.constant 0 : i32
    %c0_i32_1 = arith.constant 0 : i32
    return %c0_i32, %c0_i32_0 : i32, i32
  }
  func.func @transform_3(%arg0: i32) -> (i32, i32) {
    %c0_i32 = arith.constant 0 : i32
    %c0_i32_0 = arith.constant 0 : i32
    %c0_i32_1 = arith.constant 0 : i32
    return %c0_i32, %c0_i32_0 : i32, i32
  }
  func.func @transform_4(%arg0: i32) -> (i32, i32, i32) {
    %c0_i32 = arith.constant 0 : i32
    %c0_i32_0 = arith.constant 0 : i32
    %c0_i32_1 = arith.constant 0 : i32
    return %arg0, %c0_i32, %c0_i32_0 : i32, i32, i32
  }
  func.func @transform_5(%arg0: i32) -> (i32, i32, i32) {
    %c0_i32 = arith.constant 0 : i32
    %c0_i32_0 = arith.constant 0 : i32
    %c0_i32_1 = arith.constant 0 : i32
    return %arg0, %c0_i32, %c0_i32_0 : i32, i32, i32
  }
}

</mosaic_0001>

<bundles_post_ra>
// kernel: gaan_forward.1
= control target key start
LH: loop header
LB: loop body
LE: loop exit
PB: predicated region body
PF: predicated region fallthrough
CT: control target
= control target key end

     0   :  { %11 = vsyncpa [#allocation3], 0  ;;  %s3240_s0 = inlined_call_operand.vmem [shape: f32[4,16,128], index: 0, kind: input, shape index: {}]   ;;  %s3241_s1 = inlined_call_operand.vmem [shape: f32[4,32,128], index: 1, kind: input, shape index: {}]   ;;  %s3242_s2 = inlined_call_operand.vmem [shape: f32[240,64], index: 2, kind: input, shape index: {}]   ;;  %s3243_s3 = inlined_call_operand.vmem [shape: f32[432,1], index: 3, kind: input, shape index: {}]   ;;  %s3244_s4 = inlined_call_operand.hbm [shape: f32[4,32,128], index: 4, kind: output, shape index: {0}]   ;;  %s3245_s5 = inlined_call_operand.vmem [shape: f32[4,128,256], index: 5, kind: output, shape index: {1}]  }
   0x1   :  { %13 = vsyncpa [#allocation3 + $0x1], 0  ;;  %s2624_s18 = smov 0   ;;  %s2626_s19 = smov 0  }
   0x2   :  { %s2628_s20 = smov 0   ;;  %s2630_s21 = smov 0  }
   0x3 LB: > { %s2645_s22 = sadd.s32 4294967295, %s2587_s21   ;;  %s2162_s23 = sadd.s32 4294967294, %s2587_s21   ;;  %s2587_s21 = sphi %s2630_s21, %s3251_s21   ;;  %s2583_s20 = sphi %s2628_s20, %s3250_s20   ;;  %s2579_s19 = sphi %s2626_s19, %s3249_s19   ;;  %s2575_s18 = sphi %s2624_s18, %s3248_s18  }
   0x4   : > { %s2649_s24 = sadd.s32 1, %s2587_s21   ;;  %s120_s25 = sadd.s32 1, %s2583_s20 }
   0x5   : > { %s117_s26 = ssub.s32 %s2587_s21, %s2649_s24  ;;  %p130_p0 = scmp.ne.s32.totalorder %s2583_s20, %s2579_s19 }
   0x6   : > { %p118_p1 = scmp.eq.s32.totalorder %s117_s26, 0  ;;  %p131_p2 = scmp.eq.s32.totalorder %s2645_s22, 3 }
   0x7   : > { %p136_p3 = scmp.ne.s32.totalorder %s2579_s19, %s2575_s18  ;;  %p137_p4 = scmp.eq.s32.totalorder %s2162_s23, 3 }
   0x8   : > { %s2660_s27 = scalar_select %p118_p1, %s2583_s20, %s120_s25  }
   0x9   : > { %p2662_p5 = por %p131_p2, %p130_p0  ;;  %p2666_p6 = por %p137_p4, %p136_p3 }
   0xa   : > { %p2165_p7 = scmp.ge.s32.totalorder %s2587_s21, 1  ;;  %p203_p8 = scmp.lt.s32.totalorder %s2587_s21, 5 }
   0xc   : > { %p204_p9 = pnand %p2165_p7, %p203_p8 }
   0xd   : > { %p241_p10 = scmp.lt.s32.totalorder (!%p204_p9), %s2645_s22, 3  ;;  %v258_v0 = vld [vmem:[%s3242_s2] sm:$0xff] (!%p204_p9)  ;;  %vm286_vm0 = vcmask (!%p204_p9), 130048   ;;  %v2589_v1 = vmov (!%p204_p9), 0   ;;  %v264_v3 = vld [vmem:[%s3243_s3 + $0x10] sm:$0xff] (!%p204_p9)  ;;  %v263_v4 = vld [vmem:[%s3243_s3 + $0x8] sm:$0xff] (!%p204_p9) }
   0xe   : > { %207 = sbr.rel (%p204_p9) target bundleno = 2535 (0x9e7), region = 36  ;;  %2278 = vmatprep.mubr.msk.f32.mxu0 (!%p204_p9), %vm286_vm0, %v258_v0  ;;  %2435 = vset.pattern.permute.xlu0 (!%p204_p9), %v2589_v1  ;;  %v262_v2 = vld [vmem:[%s3243_s3] sm:$0xff] (!%p204_p9)  ;;  %v265_v5 = vld [vmem:[%s3243_s3 + $0x18] sm:$0xff] (!%p204_p9)  ;;  %v259_v9 = vld [vmem:[%s3242_s2 + $0x8] sm:$0xff] (!%p204_p9)  ;;  %vm557_vm1 = vcmask (!%p204_p9), 261120   ;;  %vm947_vm2 = vcmask (!%p204_p9), 523264  }
   0xf   : > { %268 = vperm.xlu0 (!%p204_p9), %2435, %v262_v2   ;;  %2436 = vset.pattern.permute.xlu1 (!%p204_p9), %v2589_v1  ;;  %v260_v10 = vld [vmem:[%s3242_s2 + $0x10] sm:$0xff] (!%p204_p9)  ;;  %v261_v11 = vld [vmem:[%s3242_s2 + $0x18] sm:$0xff] (!%p204_p9)  ;;  %v434_v59 = vld [vmem:[%s3243_s3 + $0x28] sm:$0xff] (!%p204_p9)  ;;  %s231_s15 = sand.u32 (!%p204_p9), 1, %s2579_s19   ;;  %s2243_s11 = sshll.u32 (!%p204_p9), %s2645_s22, 9 }
  0x10   : > { %278 = vperm.xlu1 (!%p204_p9), %2436, %v264_v3   ;;  %v435_v63 = vld [vmem:[%s3243_s3 + $0x30] sm:$0xff] (!%p204_p9)  ;;  %v433_v0 = vld [vmem:[%s3243_s3 + $0x20] sm:$0xff] (!%p204_p9)  ;;  %s2166_s17 = sshll.u32 (!%p204_p9), %s231_s15, 5 }
  0x11   : > { %s3012_s30 = scalar_lea.vmem (!%p204_p9), [#allocation2], %s2166_s17  ;;  %s3167_s17 = scalar_lea.sflag (!%p204_p9), [#allocation3], %s231_s15 }
  0x12   : > { %s2060_s8 = sshll.u32 (!%p204_p9), %s3012_s30, 4  ;;  %s3152_s8 = int_to_ptr.vmem [resolvable:$true] %s2060_s8 }
  0x13   : > { %273 = vperm.xlu0 (!%p204_p9), %2435, %v263_v4   ;;  %s2525_s23 = scalar_lea.vmem (!%p204_p9), %s3152_s8, 512 }
  0x14   : > { %283 = vperm.xlu1 (!%p204_p9), %2436, %v265_v5   ;;  %v443_v5 = vld [vmem:[%s3243_s3 + $0x50] sm:$0xff] (!%p204_p9)  ;;  %p2526_p11 = scmp.ne.s32.totalorder (!%p204_p9), %s3152_s8, %s2525_s23 }
  0x15   : > { %s2681_s9 = scalar_select %p241_p10, %s2645_s22, 3 }
  0x16   : > { %p2527_p12 = pnand %p2526_p11, %p2662_p5  ;;  %s2591_s22 = smov [#allocation2]  }
  0x17   : > { %s2240_s14 = sshll.u32 %s2681_s9, 4  ;;  %s2241_s16 = sshll.u32 %s2681_s9, 5 }
  0x18   : > { %s245_s25 = scalar_lea.vmem %s3240_s0, %s2240_s14  ;;  %s250_s26 = scalar_lea.vmem %s3241_s1, %s2241_s16 }
  0x19   : > { %v256_v6 = vld [vmem:[%s245_s25] sm:$0xff]  ;;  %v257_v7 = vld [vmem:[%s245_s25 + $0x8] sm:$0xff]  ;;  %s2242_s10 = sshll.u32 %s2681_s9, 8  ;;  %s3158_s14 = scalar_lea.hbm %s3244_s4, %s2243_s11 }
  0x1a   : > { %v2326_v8 = vpack.c.bf16 %v257_v7, %v256_v6  ;;  %s3163_s9 = scalar_lea.vmem %s3245_s5, %s2242_s10  ;;  %p2528_p13 = pneg %p2527_p12 }
  0x1b   : > { %s2529_s25 = sshll.u32 %s2591_s22, 4  ;;  %s2530_s25 = int_to_ptr.vmem [resolvable:$false] %s2529_s25 }
  0x1c   : > { %2327 = vmatprep.subr.bf16.mxu0 %v2326_v8  ;;  %p2532_p0 = scmp.lt.s32.totalorder %s3152_s8, %s2530_s25 }
  0x1d   : > { %2329 = vmatpush3.bf16.msra.mxu0 %v2326_v8  ;;  %v442_v8 = vld [vmem:[%s3243_s3 + $0x48] sm:$0xff] }
  0x20   : > { %2279 = vmatmul.mubr.msk.f32.vlgmr.msra.gmra.mrb[0].mxu0 %vm286_vm0, %v259_v9 }
  0x21   : > { %2281 = vmatprep.mubr.msk.f32.mxu0 %vm286_vm0, %v260_v10 }
  0x24   : > { %2282 = vmatmul.mubr.msk.f32.gmra.mrb[2].mxu0 %vm286_vm0, %v261_v11  ;;  %v436_v11 = vld [vmem:[%s3243_s3 + $0x38] sm:$0xff] }
  0x8e   : > { %v269_v12 = vpop.permute.xlu0 %268 }
  0x8f   : > { %v279_v19 = vpop.permute.xlu1 %278 }
  0x92   : > { %v274_v13 = vpop.permute.xlu0 %273 }
  0x93   : > { %v284_v26 = vpop.permute.xlu1 %283 }
  0xf3   : > { %v2280_v14 = vpop.f32.mrb[0].mxu0 }
  0xf4   : > { %v371_v15 = vadd.f32 %v2280_v14, %v274_v13  ;;  %v365_v16 = vpop.f32.mrb[1].mxu0  ;;  %v509_v13 = vld [vmem:[%s3243_s3 + $0x60] sm:$0xff] }
  0xf5   : > { %v366_v17 = vadd.f32 %v365_v16, %v269_v12  ;;  %v441_v16 = vld [vmem:[%s3243_s3 + $0x40] sm:$0xff] }
  0xf6   : > { %v2708_v18 = vmax.f32 %v371_v15, 0.0 }
  0xf7   : > { %v2710_v20 = vmax.f32 %v366_v17, 0.0  ;;  %v2283_v21 = vpop.f32.mrb[2].mxu0  ;;  %v511_v17 = vld [vmem:[%s3243_s3 + $0x70] sm:$0xff] }
  0xf8   : > { %394 = vadd.xlane.f32.xlu1 %v2708_v18  ;;  %v375_v22 = vpop.f32.mrb[3].mxu0  ;;  %v389_v25 = vmul.f32 %v2708_v18, %v2708_v18  ;;  %v381_v28 = vadd.f32 %v2283_v21, %v284_v26  ;;  %v515_v26 = vld [vmem:[%s3243_s3 + $0x90] sm:$0xff] }
  0xf9   : > { %v376_v23 = vadd.f32 %v375_v22, %v279_v19  ;;  %392 = vadd.xlane.f32.xlu0 %v2710_v20  ;;  %v388_v29 = vmul.f32 %v2710_v20, %v2710_v20  ;;  %v444_v22 = vld [vmem:[%s3243_s3 + $0x58] sm:$0xff] }
  0xfa   : > { %v2723_v30 = vmax.f32 %v381_v28, 0.0  ;;  %v512_v28 = vld [vmem:[%s3243_s3 + $0x78] sm:$0xff] }
  0xfb   : > { %v2714_v24 = vmax.f32 %v376_v23, 0.0  ;;  %v513_v23 = vld [vmem:[%s3243_s3 + $0x80] sm:$0xff] }
  0xfc   : > { %v391_v31 = vmul.f32 %v2723_v30, %v2723_v30 }
  0xfd   : > { %396 = vadd.xlane.f32.xlu1 %v2714_v24  ;;  %402 = vadd.xlane.f32.xlu0 %v389_v25  ;;  %v390_v27 = vmul.f32 %v2714_v24, %v2714_v24 }
 0x101   : > { %404 = vadd.xlane.f32.xlu1 %v390_v27  ;;  %400 = vadd.xlane.f32.xlu0 %v388_v29  ;;  %v510_v27 = vld [vmem:[%s3243_s3 + $0x68] sm:$0xff]  ;;  %v501_v29 = vld [vmem:[%s3242_s2 + $0x20] sm:$0xff] }
 0x102   : > { %2292 = vmatprep.mubr.msk.f32.mxu1 %vm557_vm1, %v501_v29 }
 0x105   : > { %398 = vadd.xlane.f32.xlu0 %v2723_v30 }
 0x109   : > { %406 = vadd.xlane.f32.xlu0 %v391_v31  ;;  %v514_v31 = vld [vmem:[%s3243_s3 + $0x88] sm:$0xff] }
 0x185   : > { %v395_v32 = vpop.xlane.xlu1 %394 }
 0x186   : > { %v393_v33 = vpop.xlane.xlu0 %392  ;;  %v410_v34 = vmul.f32 0.0078125, %v395_v32  ;;  %v516_v32 = vld [vmem:[%s3243_s3 + $0x98] sm:$0xff] }
 0x187   : > { %v409_v38 = vmul.f32 0.0078125, %v393_v33 }
 0x188   : > { %v418_v37 = vmul.f32 %v410_v34, %v410_v34 }
 0x189   : > { %v417_v45 = vmul.f32 %v409_v38, %v409_v38 }
 0x18a   : > { %v397_v35 = vpop.xlane.xlu1 %396  ;;  %v403_v36 = vpop.xlane.xlu0 %402 }
 0x18b   : > { %v411_v39 = vmul.f32 0.0078125, %v397_v35  ;;  %v414_v40 = vmul.f32 0.0078125, %v403_v36 }
 0x18d   : > { %v419_v41 = vmul.f32 %v411_v39, %v411_v39  ;;  %v422_v42 = vsub.f32 %v414_v40, %v418_v37 }
 0x18e   : > { %v405_v43 = vpop.xlane.xlu1 %404  ;;  %v401_v44 = vpop.xlane.xlu0 %400 }
 0x18f   : > { %v426_v46 = vadd.f32 1e-05, %v422_v42  ;;  %v415_v47 = vmul.f32 0.0078125, %v405_v43  ;;  %v413_v48 = vmul.f32 0.0078125, %v401_v44 }
 0x191   : > { %2437 = vrsqrt.f32 %v426_v46  ;;  %v423_v49 = vsub.f32 %v415_v47, %v419_v41  ;;  %v421_v50 = vsub.f32 %v413_v48, %v417_v45 }
 0x192   : > { %v399_v51 = vpop.xlane.xlu0 %398 }
 0x193   : > { %v427_v52 = vadd.f32 1e-05, %v423_v49  ;;  %v425_v53 = vadd.f32 1e-05, %v421_v50  ;;  %v412_v54 = vmul.f32 0.0078125, %v399_v51  ;;  %v506_v51 = vld [vmem:[%s3242_s2 + $0x48] sm:$0xff] }
 0x195   : > { %2439 = vrsqrt.f32 %v427_v52  ;;  %v420_v56 = vmul.f32 %v412_v54, %v412_v54  ;;  %v507_v52 = vld [vmem:[%s3242_s2 + $0x50] sm:$0xff] }
 0x196   : > { %2441 = vrsqrt.f32 %v425_v53  ;;  %v407_v55 = vpop.xlane.xlu0 %406  ;;  %v508_v53 = vld [vmem:[%s3242_s2 + $0x58] sm:$0xff] }
 0x197   : > { %v416_v57 = vmul.f32 0.0078125, %v407_v55 }
 0x199   : > { %v424_v58 = vsub.f32 %v416_v57, %v420_v56 }
 0x19b   : > { %v2438_v60 = vpop.eup %2437  ;;  %v428_v61 = vadd.f32 1e-05, %v424_v58 }
 0x19c   : > { %v438_v62 = vmul.f32 %v2438_v60, %v434_v59 }
 0x19d   : > { %2443 = vrsqrt.f32 %v428_v61 }
 0x19e   : > { %460 = vperm.xlu0 %2435, %v438_v62   ;;  %v446_v6 = vmul.f32 %v438_v62, %v410_v34 }
 0x19f   : > { %v2440_v1 = vpop.eup %2439 }
 0x1a0   : > { %v2442_v2 = vpop.eup %2441  ;;  %v439_v3 = vmul.f32 %v2440_v1, %v435_v63  ;;  %v450_v10 = vsub.f32 %v442_v8, %v446_v6 }
 0x1a1   : > { %v437_v4 = vmul.f32 %v2442_v2, %v433_v0 }
 0x1a2   : > { %465 = vperm.xlu0 %2435, %v439_v3   ;;  %v447_v7 = vmul.f32 %v439_v3, %v411_v39 }
 0x1a3   : > { %455 = vperm.xlu1 %2436, %v437_v4   ;;  %v445_v15 = vmul.f32 %v437_v4, %v409_v38 }
 0x1a4   : > { %v451_v9 = vsub.f32 %v443_v5, %v447_v7 }
 0x1a5   : > { %v449_v19 = vsub.f32 %v441_v16, %v445_v15 }
 0x1a6   : > { %489 = vperm.xlu0 %2435, %v451_v9  }
 0x1a7   : > { %v2444_v12 = vpop.eup %2443  ;;  %484 = vperm.xlu1 %2436, %v450_v10  }
 0x1a8   : > { %v440_v14 = vmul.f32 %v2444_v12, %v436_v11 }
 0x1aa   : > { %519 = vperm.xlu0 %2435, %v509_v13   ;;  %v448_v21 = vmul.f32 %v440_v14, %v412_v54 }
 0x1ab   : > { %470 = vperm.xlu1 %2436, %v440_v14  }
 0x1ac   : > { %v452_v25 = vsub.f32 %v444_v22, %v448_v21 }
 0x1ae   : > { %529 = vperm.xlu0 %2435, %v511_v17  }
 0x1af   : > { %479 = vperm.xlu1 %2436, %v449_v19  }
 0x1b2   : > { %539 = vperm.xlu0 %2435, %v513_v23  }
 0x1b3   : > { %494 = vperm.xlu1 %2436, %v452_v25  }
 0x1b6   : > { %549 = vperm.xlu0 %2435, %v515_v26  }
 0x1b7   : > { %524 = vperm.xlu1 %2436, %v510_v27  }
 0x1bb   : > { %534 = vperm.xlu1 %2436, %v512_v28  }
 0x1bf   : > { %544 = vperm.xlu1 %2436, %v514_v31  }
 0x1c3   : > { %554 = vperm.xlu1 %2436, %v516_v32  }
 0x21d   : > { %v461_v34 = vpop.permute.xlu0 %460 }
 0x21e   : > { %v474_v38 = vmul.f32 %v461_v34, %v2708_v18  ;;  %v502_v18 = vld [vmem:[%s3242_s2 + $0x28] sm:$0xff] }
 0x221   : > { %v466_v36 = vpop.permute.xlu0 %465 }
 0x222   : > { %v456_v33 = vpop.permute.xlu1 %455  ;;  %v475_v44 = vmul.f32 %v466_v36, %v2714_v24  ;;  %v504_v24 = vld [vmem:[%s3242_s2 + $0x38] sm:$0xff] }
 0x223   : > { %v473_v39 = vmul.f32 %v456_v33, %v2710_v20  ;;  %v503_v20 = vld [vmem:[%s3242_s2 + $0x30] sm:$0xff] }
 0x225   : > { %v490_v43 = vpop.permute.xlu0 %489 }
 0x226   : > { %v485_v35 = vpop.permute.xlu1 %484  ;;  %v499_v48 = vadd.f32 %v490_v43, %v475_v44 }
 0x227   : > { %v498_v41 = vadd.f32 %v485_v35, %v474_v38 }
 0x229   : > { %v520_v54 = vpop.permute.xlu0 %519 }
 0x22a   : > { %v471_v37 = vpop.permute.xlu1 %470 }
 0x22b   : > { %v476_v45 = vmul.f32 %v471_v37, %v2723_v30  ;;  %v505_v30 = vld [vmem:[%s3242_s2 + $0x40] sm:$0xff] }
 0x22d   : > { %v530_v63 = vpop.permute.xlu0 %529 }
 0x22e   : > { %v480_v40 = vpop.permute.xlu1 %479 }
 0x22f   : > { %v497_v42 = vadd.f32 %v480_v40, %v473_v39 }
 0x231   : > { %v2330_v46 = vpack.c.bf16 %v498_v41, %v497_v42  ;;  %v540_v6 = vpop.permute.xlu0 %539 }
 0x232   : > { %v495_v47 = vpop.permute.xlu1 %494 }
 0x233   : > { %v500_v49 = vadd.f32 %v495_v47, %v476_v45  ;;  %2331 = vmatprep.subr.bf16.mxu1 %v2330_v46 }
 0x234   : > { %2333 = vmatpush3.bf16.msra.mxu1 %v2330_v46 }
 0x235   : > { %v2334_v50 = vpack.c.bf16 %v500_v49, %v499_v48  ;;  %v550_v16 = vpop.permute.xlu0 %549 }
 0x236   : > { %v525_v55 = vpop.permute.xlu1 %524 }
 0x237   : > { %2335 = vmatprep.subr.bf16.mxu1 %v2334_v50 }
 0x238   : > { %2337 = vmatpush3.bf16.msra.mxu1 %v2334_v50 }
 0x23a   : > { %v535_v7 = vpop.permute.xlu1 %534 }
 0x23b   : > { %2293 = vmatmul.mubr.msk.f32.vlgmr.msra.gmra.mrb[0].mxu1 %vm557_vm1, %v502_v18 }
 0x23c   : > { %2295 = vmatprep.mubr.msk.f32.mxu1 %vm557_vm1, %v503_v20 }
 0x23e   : > { %v545_v17 = vpop.permute.xlu1 %544 }
 0x23f   : > { %2296 = vmatmul.mubr.msk.f32.gmra.mrb[2].mxu1 %vm557_vm1, %v504_v24 }
 0x240   : > { %2298 = vmatprep.mubr.msk.f32.mxu1 %vm557_vm1, %v505_v30 }
 0x242   : > { %v555_v27 = vpop.permute.xlu1 %554 }
 0x243   : > { %2299 = vmatmul.mubr.msk.f32.gmra.mrb[4].mxu1 %vm557_vm1, %v506_v51 }
 0x244   : > { %2301 = vmatprep.mubr.msk.f32.mxu1 %vm557_vm1, %v507_v52 }
 0x247   : > { %2302 = vmatmul.mubr.msk.f32.gmra.mrb[6].mxu1 %vm557_vm1, %v508_v53 }
 0x30e   : > { %v2294_v56 = vpop.f32.mrb[0].mxu1 }
 0x30f   : > { %v654_v57 = vadd.f32 %v2294_v56, %v525_v55  ;;  %v648_v58 = vpop.f32.mrb[1].mxu1 }
 0x310   : > { %v649_v59 = vadd.f32 %v648_v58, %v520_v54 }
 0x311   : > { %v2812_v60 = vmax.f32 %v654_v57, 0.0 }
 0x312   : > { %v2814_v61 = vmax.f32 %v649_v59, 0.0  ;;  %v2297_v62 = vpop.f32.mrb[2].mxu1 }
 0x313   : > { %705 = vadd.xlane.f32.xlu1 %v2812_v60  ;;  %v658_v0 = vpop.f32.mrb[3].mxu1  ;;  %v696_v4 = vmul.f32 %v2812_v60, %v2812_v60  ;;  %v664_v8 = vadd.f32 %v2297_v62, %v535_v7 }
 0x314   : > { %v659_v1 = vadd.f32 %v658_v0, %v530_v63  ;;  %703 = vadd.xlane.f32.xlu0 %v2814_v61  ;;  %v695_v11 = vmul.f32 %v2814_v61, %v2814_v61 }
 0x315   : > { %v2827_v14 = vmax.f32 %v664_v8, 0.0 }
 0x316   : > { %v2818_v2 = vmax.f32 %v659_v1, 0.0  ;;  %v2300_v3 = vpop.f32.mrb[4].mxu1  ;;  %v784_v1 = vld [vmem:[%s3243_s3 + $0xa8] sm:$0xff] }
 0x317   : > { %v668_v5 = vpop.f32.mrb[5].mxu1  ;;  %v674_v19 = vadd.f32 %v2300_v3, %v545_v17  ;;  %v698_v22 = vmul.f32 %v2827_v14, %v2827_v14 }
 0x318   : > { %721 = vadd.xlane.f32.xlu0 %v696_v4  ;;  %707 = vadd.xlane.f32.xlu1 %v2818_v2  ;;  %v669_v9 = vadd.f32 %v668_v5, %v540_v6  ;;  %v697_v12 = vmul.f32 %v2818_v2, %v2818_v2 }
 0x319   : > { %v2837_v25 = vmax.f32 %v674_v19, 0.0 }
 0x31a   : > { %v2303_v10 = vpop.f32.mrb[6].mxu1  ;;  %v2829_v15 = vmax.f32 %v669_v9, 0.0 }
 0x31b   : > { %v678_v13 = vpop.f32.mrb[7].mxu1  ;;  %v684_v28 = vadd.f32 %v2303_v10, %v555_v27  ;;  %v700_v29 = vmul.f32 %v2837_v25, %v2837_v25 }
 0x31c   : > { %719 = vadd.xlane.f32.xlu0 %v695_v11  ;;  %723 = vadd.xlane.f32.xlu1 %v697_v12  ;;  %v679_v21 = vadd.f32 %v678_v13, %v550_v16  ;;  %v699_v23 = vmul.f32 %v2829_v15, %v2829_v15  ;;  %v785_v11 = vld [vmem:[%s3243_s3 + $0xb0] sm:$0xff]  ;;  %v783_v16 = vld [vmem:[%s3243_s3 + $0xa0] sm:$0xff] }
 0x31d   : > { %v2847_v32 = vmax.f32 %v684_v28, 0.0 }
 0x31e   : > { %v2839_v26 = vmax.f32 %v679_v21, 0.0 }
 0x31f   : > { %v702_v33 = vmul.f32 %v2847_v32, %v2847_v32 }
 0x320   : > { %709 = vadd.xlane.f32.xlu0 %v2827_v14  ;;  %711 = vadd.xlane.f32.xlu1 %v2829_v15  ;;  %v701_v31 = vmul.f32 %v2839_v26, %v2839_v26 }
 0x324   : > { %725 = vadd.xlane.f32.xlu0 %v698_v22  ;;  %727 = vadd.xlane.f32.xlu1 %v699_v23 }
 0x328   : > { %713 = vadd.xlane.f32.xlu0 %v2837_v25  ;;  %715 = vadd.xlane.f32.xlu1 %v2839_v26 }
 0x32c   : > { %729 = vadd.xlane.f32.xlu0 %v700_v29  ;;  %731 = vadd.xlane.f32.xlu1 %v701_v31 }
 0x330   : > { %717 = vadd.xlane.f32.xlu0 %v2847_v32 }
 0x334   : > { %733 = vadd.xlane.f32.xlu0 %v702_v33 }
 0x3a0   : > { %v706_v34 = vpop.xlane.xlu1 %705 }
 0x3a1   : > { %v704_v35 = vpop.xlane.xlu0 %703  ;;  %v736_v36 = vmul.f32 0.0078125, %v706_v34  ;;  %v801_v34 = vld [vmem:[%s3243_s3 + $0xf0] sm:$0xff] }
 0x3a2   : > { %v2852_v37 = vmul.f32 0.0078125, %v704_v35 }
 0x3a3   : > { %v752_v40 = vmul.f32 %v736_v36, %v736_v36 }
 0x3a4   : > { %v751_v44 = vmul.f32 %v2852_v37, %v2852_v37 }
 0x3a5   : > { %v708_v38 = vpop.xlane.xlu1 %707  ;;  %v722_v39 = vpop.xlane.xlu0 %721 }
 0x3a6   : > { %v737_v41 = vmul.f32 0.0078125, %v708_v38  ;;  %v744_v42 = vmul.f32 0.0078125, %v722_v39 }
 0x3a8   : > { %v760_v43 = vsub.f32 %v744_v42, %v752_v40  ;;  %v753_v47 = vmul.f32 %v737_v41, %v737_v41  ;;  %v800_v40 = vld [vmem:[%s3243_s3 + $0xe8] sm:$0xff] }
 0x3a9   : > { %v724_v45 = vpop.xlane.xlu1 %723  ;;  %v720_v46 = vpop.xlane.xlu0 %719 }
 0x3aa   : > { %v768_v48 = vadd.f32 1e-05, %v760_v43  ;;  %v745_v49 = vmul.f32 0.0078125, %v724_v45  ;;  %v743_v50 = vmul.f32 0.0078125, %v720_v46 }
 0x3ac   : > { %2445 = vrsqrt.f32 %v768_v48  ;;  %v761_v18 = vsub.f32 %v745_v49, %v753_v47  ;;  %v759_v20 = vsub.f32 %v743_v50, %v751_v44  ;;  %v787_v47 = vld [vmem:[%s3243_s3 + $0xc0] sm:$0xff] }
 0x3ad   : > { %v712_v24 = vpop.xlane.xlu1 %711  ;;  %v710_v30 = vpop.xlane.xlu0 %709 }
 0x3ae   : > { %v769_v51 = vadd.f32 1e-05, %v761_v18  ;;  %v767_v52 = vadd.f32 1e-05, %v759_v20  ;;  %v2856_v53 = vmul.f32 0.0078125, %v712_v24  ;;  %v2858_v54 = vmul.f32 0.0078125, %v710_v30 }
 0x3b0   : > { %2447 = vrsqrt.f32 %v769_v51  ;;  %v755_v57 = vmul.f32 %v2856_v53, %v2856_v53  ;;  %v754_v58 = vmul.f32 %v2858_v54, %v2858_v54  ;;  %v803_v51 = vld [vmem:[%s3243_s3 + $0x100] sm:$0xff] }
 0x3b1   : > { %2449 = vrsqrt.f32 %v767_v52  ;;  %v728_v55 = vpop.xlane.xlu1 %727  ;;  %v726_v56 = vpop.xlane.xlu0 %725 }
 0x3b2   : > { %v747_v59 = vmul.f32 0.0078125, %v728_v55  ;;  %v746_v62 = vmul.f32 0.0078125, %v726_v56  ;;  %v799_v56 = vld [vmem:[%s3243_s3 + $0xe0] sm:$0xff] }
 0x3b4   : > { %v763_v63 = vsub.f32 %v747_v59, %v755_v57  ;;  %v762_v0 = vsub.f32 %v746_v62, %v754_v58  ;;  %v789_v62 = vld [vmem:[%s3243_s3 + $0xd0] sm:$0xff] }
 0x3b5   : > { %v716_v3 = vpop.xlane.xlu1 %715  ;;  %v714_v4 = vpop.xlane.xlu0 %713 }
 0x3b6   : > { %v2446_v5 = vpop.eup %2445  ;;  %v771_v6 = vadd.f32 1e-05, %v763_v63  ;;  %v770_v7 = vadd.f32 1e-05, %v762_v0  ;;  %v2867_v8 = vmul.f32 0.0078125, %v716_v3  ;;  %v2869_v9 = vmul.f32 0.0078125, %v714_v4 }
 0x3b7   : > { %v792_v10 = vmul.f32 %v2446_v5, %v784_v1  ;;  %v805_v5 = vld [vmem:[%s3243_s3 + $0x110] sm:$0xff] }
 0x3b8   : > { %2451 = vrsqrt.f32 %v771_v6  ;;  %v757_v19 = vmul.f32 %v2867_v8, %v2867_v8  ;;  %v756_v21 = vmul.f32 %v2869_v9, %v2869_v9 }
 0x3b9   : > { %2453 = vrsqrt.f32 %v770_v7  ;;  %v732_v12 = vpop.xlane.xlu1 %731  ;;  %830 = vperm.xlu0 %2435, %v792_v10   ;;  %v730_v13 = vpop.xlane.xlu0 %729  ;;  %v808_v35 = vmul.f32 %v792_v10, %v736_v36 }
 0x3ba   : > { %v2448_v17 = vpop.eup %2447  ;;  %v749_v22 = vmul.f32 0.0078125, %v732_v12  ;;  %v748_v23 = vmul.f32 0.0078125, %v730_v13  ;;  %v790_v12 = vld [vmem:[%s3243_s3 + $0xd8] sm:$0xff] }
 0x3bb   : > { %v2450_v27 = vpop.eup %2449  ;;  %v793_v28 = vmul.f32 %v2448_v17, %v785_v11  ;;  %v816_v46 = vsub.f32 %v800_v40, %v808_v35  ;;  %v804_v11 = vld [vmem:[%s3243_s3 + $0x108] sm:$0xff]  ;;  %v1268_v40 = vld [vmem:[%s3243_s3 + $0x190] sm:$0xff] }
 0x3bc   : > { %v765_v29 = vsub.f32 %v749_v22, %v757_v19  ;;  %v764_v31 = vsub.f32 %v748_v23, %v756_v21  ;;  %v791_v33 = vmul.f32 %v2450_v27, %v783_v16  ;;  %v923_v16 = vld [vmem:[%s3243_s3 + $0x120] sm:$0xff]  ;;  %v806_v21 = vld [vmem:[%s3243_s3 + $0x118] sm:$0xff]  ;;  %v1063_v27 = vld [vmem:[%s3243_s3 + $0x150] sm:$0xff] }
 0x3bd   : > { %835 = vperm.xlu0 %2435, %v793_v28   ;;  %v718_v38 = vpop.xlane.xlu0 %717  ;;  %v809_v39 = vmul.f32 %v793_v28, %v737_v41  ;;  %v786_v41 = vld [vmem:[%s3243_s3 + $0xb8] sm:$0xff]  ;;  %v1061_v22 = vld [vmem:[%s3243_s3 + $0x140] sm:$0xff]  ;;  %v924_v28 = vld [vmem:[%s3243_s3 + $0x128] sm:$0xff] }
 0x3be   : > { %v773_v42 = vadd.f32 1e-05, %v765_v29  ;;  %v772_v43 = vadd.f32 1e-05, %v764_v31  ;;  %825 = vperm.xlu1 %2436, %v791_v33   ;;  %v742_v44 = vmul.f32 0.0078125, %v718_v38  ;;  %v807_v52 = vmul.f32 %v791_v33, %v2852_v37  ;;  %v802_v37 = vld [vmem:[%s3243_s3 + $0xf8] sm:$0xff] }
 0x3bf   : > { %v817_v45 = vsub.f32 %v801_v34, %v809_v39  ;;  %v1065_v29 = vld [vmem:[%s3243_s3 + $0x160] sm:$0xff]  ;;  %v926_v31 = vld [vmem:[%s3243_s3 + $0x138] sm:$0xff]  ;;  %v1067_v34 = vld [vmem:[%s3243_s3 + $0x170] sm:$0xff] }
 0x3c0   : > { %2455 = vrsqrt.f32 %v773_v42  ;;  %v758_v49 = vmul.f32 %v742_v44, %v742_v44  ;;  %v815_v59 = vsub.f32 %v799_v56, %v807_v52  ;;  %v919_v33 = vld [vmem:[%s3242_s2 + $0x60] sm:$0xff]  ;;  %v1062_v35 = vld [vmem:[%s3243_s3 + $0x148] sm:$0xff]  ;;  %v1064_v39 = vld [vmem:[%s3243_s3 + $0x158] sm:$0xff] }
 0x3c1   : > { %2457 = vrsqrt.f32 %v772_v43  ;;  %883 = vperm.xlu0 %2435, %v817_v45   ;;  %v734_v36 = vpop.xlane.xlu0 %733  ;;  %2320 = vmatprep.mubr.msk.f32.mxu0 %vm947_vm2, %v919_v33  ;;  %v1266_v38 = vld [vmem:[%s3243_s3 + $0x180] sm:$0xff]  ;;  %v1066_v42 = vld [vmem:[%s3243_s3 + $0x168] sm:$0xff]  ;;  %v1051_v33 = vld [vmem:[%s250_s26 + $0x10] sm:$0xff] }
 0x3c2   : > { %v2452_v48 = vpop.eup %2451  ;;  %878 = vperm.xlu1 %2436, %v816_v46   ;;  %v750_v50 = vmul.f32 0.0078125, %v734_v36  ;;  %v1401_v43 = vld [vmem:[%s3243_s3 + $0x1a0] sm:$0xff]  ;;  %v1267_v45 = vld [vmem:[%s3243_s3 + $0x188] sm:$0xff]  ;;  %v1269_v46 = vld [vmem:[%s3243_s3 + $0x198] sm:$0xff] }
 0x3c3   : > { %v2454_v18 = vpop.eup %2453  ;;  %v795_v20 = vmul.f32 %v2452_v48, %v787_v47  ;;  %v1402_v47 = vld [vmem:[%s3243_s3 + $0x1a8] sm:$0xff] }
 0x3c4   : > { %v766_v24 = vsub.f32 %v750_v50, %v758_v49  ;;  %v794_v30 = vmul.f32 %v2454_v18, %v786_v41 }
 0x3c5   : > { %845 = vperm.xlu0 %2435, %v795_v20   ;;  %v811_v55 = vmul.f32 %v795_v20, %v2856_v53  ;;  %v788_v53 = vld [vmem:[%s3243_s3 + $0xc8] sm:$0xff] }
 0x3c6   : > { %v774_v57 = vadd.f32 1e-05, %v766_v24  ;;  %840 = vperm.xlu1 %2436, %v794_v30   ;;  %v810_v63 = vmul.f32 %v794_v30, %v2858_v54 }
 0x3c7   : > { %v819_v58 = vsub.f32 %v803_v51, %v811_v55 }
 0x3c8   : > { %2459 = vrsqrt.f32 %v774_v57  ;;  %v818_v4 = vsub.f32 %v802_v37, %v810_v63 }
 0x3c9   : > { %893 = vperm.xlu0 %2435, %v819_v58  }
 0x3ca   : > { %v2456_v0 = vpop.eup %2455  ;;  %873 = vperm.xlu1 %2436, %v815_v59  }
 0x3cb   : > { %v2458_v1 = vpop.eup %2457  ;;  %v797_v3 = vmul.f32 %v2456_v0, %v789_v62 }
 0x3cc   : > { %v796_v6 = vmul.f32 %v2458_v1, %v788_v53 }
 0x3cd   : > { %855 = vperm.xlu0 %2435, %v797_v3   ;;  %v813_v54 = vmul.f32 %v797_v3, %v2867_v8 }
 0x3ce   : > { %888 = vperm.xlu1 %2436, %v818_v4   ;;  %v812_v10 = vmul.f32 %v796_v6, %v2869_v9  ;;  %v925_v9 = vld [vmem:[%s3243_s3 + $0x130] sm:$0xff] }
 0x3cf   : > { %v821_v7 = vsub.f32 %v805_v5, %v813_v54 }
 0x3d0   : > { %v820_v8 = vsub.f32 %v804_v11, %v812_v10 }
 0x3d1   : > { %903 = vperm.xlu0 %2435, %v821_v7  }
 0x3d2   : > { %v2460_v13 = vpop.eup %2459  ;;  %850 = vperm.xlu1 %2436, %v796_v6  }
 0x3d3   : > { %v798_v17 = vmul.f32 %v2460_v13, %v790_v12  ;;  %v920_v12 = vld [vmem:[%s3242_s2 + $0x68] sm:$0xff]  ;;  %v921_v13 = vld [vmem:[%s3242_s2 + $0x70] sm:$0xff] }
 0x3d5   : > { %929 = vperm.xlu0 %2435, %v923_v16   ;;  %v814_v19 = vmul.f32 %v798_v17, %v742_v44  ;;  %v1068_v44 = vld [vmem:[%s3243_s3 + $0x178] sm:$0xff] }
 0x3d6   : > { %898 = vperm.xlu1 %2436, %v820_v8  }
 0x3d7   : > { %v822_v23 = vsub.f32 %v806_v21, %v814_v19  ;;  %v1050_v19 = vld [vmem:[%s250_s26 + $0x8] sm:$0xff] }
 0x3d9   : > { %939 = vperm.xlu0 %2435, %v925_v9   ;;  %v1049_v9 = vld [vmem:[%s250_s26] sm:$0xff] }
 0x3da   : > { %860 = vperm.xlu1 %2436, %v798_v17  }
 0x3dd   : > { %1071 = vperm.xlu0 %2435, %v1061_v22  }
 0x3de   : > { %908 = vperm.xlu1 %2436, %v822_v23  }
 0x3e1   : > { %1081 = vperm.xlu0 %2435, %v1063_v27   ;;  %v2356_v27 = vpack.c.bf16 %v1050_v19, %v1049_v9 }
 0x3e2   : > { %934 = vperm.xlu1 %2436, %v924_v28  }
 0x3e5   : > { %1091 = vperm.xlu0 %2435, %v1065_v29  }
 0x3e6   : > { %944 = vperm.xlu1 %2436, %v926_v31  }
 0x3e9   : > { %1101 = vperm.xlu0 %2435, %v1067_v34   ;;  %v1052_v34 = vld [vmem:[%s250_s26 + $0x18] sm:$0xff]  ;;  %s2531_s26 = scalar_lea.vmem %s2530_s25, 1024 }
 0x3ea   : > { %1076 = vperm.xlu1 %2436, %v1062_v35   ;;  %p2533_p1 = scmp.lt.s32.totalorder %s2531_s26, %s2525_s23 }
 0x3ec   : > { %p2534_p2 = por %p2533_p1, %p2532_p0 }
 0x3ed   : > { %1272 = vperm.xlu0 %2435, %v1266_v38  }
 0x3ee   : > { %1086 = vperm.xlu1 %2436, %v1064_v39   ;;  %p2535_p3 = pnand %p2534_p2, %p2528_p13 }
 0x3f1   : > { %1282 = vperm.xlu0 %2435, %v1268_v40  }
 0x3f2   : > { %1096 = vperm.xlu1 %2436, %v1066_v42   ;;  %v2360_v42 = vpack.c.bf16 %v1052_v34, %v1051_v33 }
 0x3f5   : > { %1405 = vperm.xlu0 %2435, %v1401_v43  }
 0x3f6   : > { %1106 = vperm.xlu1 %2436, %v1068_v44   ;;  %v1053_v44 = vld [vmem:[%s3242_s2 + $0x80] sm:$0xff] }
 0x3fa   : > { %1277 = vperm.xlu1 %2436, %v1267_v45   ;;  %v1054_v45 = vld [vmem:[%s3242_s2 + $0x88] sm:$0xff] }
 0x3fe   : > { %1287 = vperm.xlu1 %2436, %v1269_v46   ;;  %v1055_v46 = vld [vmem:[%s3242_s2 + $0x90] sm:$0xff] }
 0x402   : > { %1410 = vperm.xlu1 %2436, %v1402_v47   ;;  %v1056_v47 = vld [vmem:[%s3242_s2 + $0x98] sm:$0xff] }
 0x438   : > { %v831_v36 = vpop.permute.xlu0 %830 }
 0x439   : > { %v864_v20 = vmul.f32 %v831_v36, %v2812_v60  ;;  %v1057_v36 = vld [vmem:[%s3242_s2 + $0xa0] sm:$0xff] }
 0x43c   : > { %v836_v48 = vpop.permute.xlu0 %835 }
 0x43d   : > { %v826_v41 = vpop.permute.xlu1 %825  ;;  %v865_v56 = vmul.f32 %v836_v48, %v2818_v2  ;;  %v1059_v48 = vld [vmem:[%s3242_s2 + $0xb0] sm:$0xff] }
 0x43e   : > { %v863_v24 = vmul.f32 %v826_v41, %v2814_v61  ;;  %v1058_v41 = vld [vmem:[%s3242_s2 + $0xa8] sm:$0xff] }
 0x440   : > { %v884_v50 = vpop.permute.xlu0 %883 }
 0x441   : > { %v879_v49 = vpop.permute.xlu1 %878  ;;  %v913_v62 = vadd.f32 %v884_v50, %v865_v56 }
 0x442   : > { %v912_v52 = vadd.f32 %v879_v49, %v864_v20  ;;  %v1060_v49 = vld [vmem:[%s3242_s2 + $0xb8] sm:$0xff] }
 0x444   : > { %v846_v30 = vpop.permute.xlu0 %845 }
 0x445   : > { %v841_v18 = vpop.permute.xlu1 %840  ;;  %v867_v60 = vmul.f32 %v846_v30, %v2829_v15 }
 0x446   : > { %v866_v57 = vmul.f32 %v841_v18, %v2827_v14 }
 0x448   : > { %v894_v37 = vpop.permute.xlu0 %893 }
 0x449   : > { %v874_v51 = vpop.permute.xlu1 %873  ;;  %v915_v2 = vadd.f32 %v894_v37, %v867_v60 }
 0x44a   : > { %v911_v55 = vadd.f32 %v874_v51, %v863_v24 }
 0x44c   : > { %v2338_v58 = vpack.c.bf16 %v912_v52, %v911_v55  ;;  %v856_v1 = vpop.permute.xlu0 %855 }
 0x44d   : > { %v889_v59 = vpop.permute.xlu1 %888  ;;  %v869_v54 = vmul.f32 %v856_v1, %v2839_v26  ;;  %v922_v26 = vld [vmem:[%s3242_s2 + $0x78] sm:$0xff] }
 0x44e   : > { %v914_v63 = vadd.f32 %v889_v59, %v866_v57  ;;  %2339 = vmatprep.subr.bf16.mxu0 %v2338_v58 }
 0x44f   : > { %2341 = vmatpush3.bf16.msra.mxu0 %v2338_v58 }
 0x450   : > { %v2342_v53 = vpack.c.bf16 %v914_v63, %v913_v62  ;;  %v904_v6 = vpop.permute.xlu0 %903 }
 0x451   : > { %v851_v0 = vpop.permute.xlu1 %850  ;;  %v917_v11 = vadd.f32 %v904_v6, %v869_v54 }
 0x452   : > { %2343 = vmatprep.subr.bf16.mxu0 %v2342_v53  ;;  %v868_v61 = vmul.f32 %v851_v0, %v2837_v25 }
 0x453   : > { %2345 = vmatpush3.bf16.msra.mxu0 %v2342_v53 }
 0x454   : > { %v930_v8 = vpop.permute.xlu0 %929 }
 0x455   : > { %v899_v3 = vpop.permute.xlu1 %898 }
 0x456   : > { %v916_v4 = vadd.f32 %v899_v3, %v868_v61 }
 0x458   : > { %v2346_v14 = vpack.c.bf16 %v916_v4, %v915_v2  ;;  %v940_v35 = vpop.permute.xlu0 %939 }
 0x459   : > { %v861_v5 = vpop.permute.xlu1 %860 }
 0x45a   : > { %2347 = vmatprep.subr.bf16.mxu0 %v2346_v14  ;;  %v870_v7 = vmul.f32 %v861_v5, %v2847_v32  ;;  %v2590_v32 = vmov 0.0  }
 0x45b   : > { %2349 = vmatpush3.bf16.msra.mxu0 %v2346_v14  ;;  %1197 = vmatprep.mubr.f32.mxu1 %v2590_v32 }
 0x45c   : > { %v1072_v20 = vpop.permute.xlu0 %1071 }
 0x45d   : > { %v909_v10 = vpop.permute.xlu1 %908 }
 0x45e   : > { %v918_v15 = vadd.f32 %v909_v10, %v870_v7 }
 0x460   : > { %v2350_v25 = vpack.c.bf16 %v918_v15, %v917_v11  ;;  %v1082_v60 = vpop.permute.xlu0 %1081 }
 0x461   : > { %v935_v16 = vpop.permute.xlu1 %934 }
 0x462   : > { %2351 = vmatprep.subr.bf16.mxu0 %v2350_v25 }
 0x463   : > { %2353 = vmatpush3.bf16.msra.mxu0 %v2350_v25 }
 0x465   : > { %v945_v28 = vpop.permute.xlu1 %944 }
 0x466   : > { %2321 = vmatmul.mubr.msk.f32.vlgmr.msra.gmra.mrb[4].mxu0 %vm947_vm2, %v920_v12 }
 0x467   : > { %2323 = vmatprep.mubr.msk.f32.mxu0 %vm947_vm2, %v921_v13  ;;  %v1092_v13 = vpop.permute.xlu0 %1091 }
 0x469   : > { %v1077_v30 = vpop.permute.xlu1 %1076 }
 0x46a   : > { %2324 = vmatmul.mubr.msk.f32.gmra.mrb[6].mxu0 %vm947_vm2, %v922_v26 }
 0x46b   : > { %1366 = vmatprep.mubr.f32.mxu0 %v2590_v32 }
 0x46d   : > { %v1087_v3 = vpop.permute.xlu1 %1086 }
 0x539   : > { %v2322_v17 = vpop.f32.mrb[4].mxu0 }
 0x53a   : > { %v1032_v21 = vadd.f32 %v2322_v17, %v935_v16  ;;  %v1026_v22 = vpop.f32.mrb[5].mxu0 }
 0x53b   : > { %v1027_v23 = vadd.f32 %v1026_v22, %v930_v8  ;;  %v1097_v8 = vpop.permute.xlu1 %1096 }
 0x53c   : > { %1046 = vst [vmem:[%s3012_s30 + $0x8] sm:$0xff] %v1032_v21 }
 0x53d   : > { %1045 = vst [vmem:[%s3012_s30] sm:$0xff] %v1027_v23  ;;  %v2354_v29 = vpack.c.bf16 %v1032_v21, %v1027_v23  ;;  %v2325_v31 = vpop.f32.mrb[6].mxu0 }
 0x53e   : > { %v1042_v38 = vadd.f32 %v2325_v31, %v945_v28  ;;  %v1036_v39 = vpop.f32.mrb[7].mxu0 }
 0x53f   : > { %v1037_v40 = vadd.f32 %v1036_v39, %v940_v35  ;;  %2355 = vmatprep.subr.bf16.mxu1 %v2354_v29  ;;  %v1102_v35 = vpop.permute.xlu0 %1101 }
 0x540   : > { %1048 = vst [vmem:[%s3012_s30 + $0x18] sm:$0xff] %v1042_v38  ;;  %2357 = vmatpush1.bf16.msra.mxu1 %v2356_v27 }
 0x541   : > { %1047 = vst [vmem:[%s3012_s30 + $0x10] sm:$0xff] %v1037_v40  ;;  %v2358_v43 = vpack.c.bf16 %v1042_v38, %v1037_v40  ;;  %v1107_v40 = vpop.permute.xlu1 %1106 }
 0x543   : > { %2359 = vmatprep.subr.bf16.mxu1 %v2358_v43 }
 0x544   : > { %2361 = vmatpush1.bf16.msra.mxu1 %v2360_v42 }
 0x547   : > { %2189 = vmatmul.mubr.msk.f32.vlgmr.msra.gmra.mrb[8].mxu1 %vm557_vm1, %v1053_v44 }
 0x548   : > { %1203 = vmatprep.mubr.f32.mxu1 %v2590_v32 }
 0x54b   : > { %2190 = vmatmul.mubr.msk.f32.gmra.mrb[10].mxu1 %vm557_vm1, %v1054_v45 }
 0x54c   : > { %1209 = vmatprep.mubr.f32.mxu1 %v2590_v32 }
 0x54f   : > { %2191 = vmatmul.mubr.msk.f32.gmra.mrb[12].mxu1 %vm557_vm1, %v1055_v46 }
 0x550   : > { %1215 = vmatprep.mubr.f32.mxu1 %v2590_v32 }
 0x553   : > { %2192 = vmatmul.mubr.msk.f32.gmra.mrb[14].mxu1 %vm557_vm1, %v1056_v47 }
 0x554   : > { %1221 = vmatprep.mubr.f32.mxu1 %v2590_v32 }
 0x557   : > { %2193 = vmatmul.mubr.msk.f32.gmra.mrb[16].mxu1 %vm557_vm1, %v1057_v36 }
 0x558   : > { %1227 = vmatprep.mubr.f32.mxu1 %v2590_v32 }
 0x55b   : > { %2194 = vmatmul.mubr.msk.f32.gmra.mrb[18].mxu1 %vm557_vm1, %v1058_v41 }
 0x55c   : > { %1233 = vmatprep.mubr.f32.mxu1 %v2590_v32 }
 0x55f   : > { %2195 = vmatmul.mubr.msk.f32.gmra.mrb[20].mxu1 %vm557_vm1, %v1059_v48 }
 0x560   : > { %1239 = vmatprep.mubr.f32.mxu1 %v2590_v32 }
 0x563   : > { %2196 = vmatmul.mubr.msk.f32.gmra.mrb[22].mxu1 %vm557_vm1, %v1060_v49 }
 0x564   : > { %1795 = vmatprep.mubr.f32.mxu1 %v2590_v32 }
 0x61a   : > { %v1199_v50 = vpop.f32.mrb[8].mxu1 }
 0x61b   : > { %v1201_v18 = vpop.f32.mrb[9].mxu1  ;;  %v1200_v24 = vadd.f32 %v1199_v50, %v1072_v20 }
 0x61c   : > { %v1202_v51 = vadd.f32 %v1201_v18, %v1072_v20  ;;  %v1262_v18 = vld [vmem:[%s3242_s2 + $0xc0] sm:$0xff]  ;;  %v1263_v20 = vld [vmem:[%s3242_s2 + $0xc8] sm:$0xff] }
 0x61d   : > { %v1246_v58 = vmax.f32 %v1200_v24, 0.0  ;;  %v1264_v24 = vld [vmem:[%s3242_s2 + $0xd0] sm:$0xff] }
 0x61e   : > { %v1205_v52 = vpop.f32.mrb[10].mxu1  ;;  %v1247_v62 = vmax.f32 %v1202_v51, 0.0 }
 0x61f   : > { %v1206_v55 = vadd.f32 %v1205_v52, %v1077_v30  ;;  %v1207_v56 = vpop.f32.mrb[11].mxu1 }
 0x620   : > { %v1208_v57 = vadd.f32 %v1207_v56, %v1077_v30  ;;  %v1265_v30 = vld [vmem:[%s3242_s2 + $0xd8] sm:$0xff] }
 0x621   : > { %v1248_v59 = vmax.f32 %v1206_v55, 0.0  ;;  %v1273_v55 = vpop.permute.xlu0 %1272 }
 0x622   : > { %v1249_v63 = vmax.f32 %v1208_v57, 0.0  ;;  %v1211_v37 = vpop.f32.mrb[12].mxu1  ;;  %v1278_v57 = vpop.permute.xlu1 %1277 }
 0x623   : > { %v2364_v53 = vpack.c.bf16 %v1248_v59, %v1246_v58  ;;  %v1213_v0 = vpop.f32.mrb[13].mxu1  ;;  %v1212_v1 = vadd.f32 %v1211_v37, %v1082_v60 }
 0x624   : > { %v2362_v61 = vpack.c.bf16 %v1249_v63, %v1247_v62  ;;  %v1214_v2 = vadd.f32 %v1213_v0, %v1082_v60 }
 0x625   : > { %v1250_v54 = vmax.f32 %v1212_v1, 0.0 }
 0x626   : > { %v1217_v4 = vpop.f32.mrb[14].mxu1  ;;  %2363 = vmatprep.subr.bf16.mxu0 %v2362_v61  ;;  %v1251_v10 = vmax.f32 %v1214_v2, 0.0 }
 0x627   : > { %v1218_v14 = vadd.f32 %v1217_v4, %v1087_v3  ;;  %v1219_v5 = vpop.f32.mrb[15].mxu1  ;;  %2365 = vmatpush1.bf16.msra.mxu0 %v2364_v53  ;;  %v1283_v4 = vpop.permute.xlu0 %1282 }
 0x628   : > { %v1220_v6 = vadd.f32 %v1219_v5, %v1087_v3 }
 0x629   : > { %v1252_v7 = vmax.f32 %v1218_v14, 0.0 }
 0x62a   : > { %v1253_v11 = vmax.f32 %v1220_v6, 0.0  ;;  %v1223_v15 = vpop.f32.mrb[16].mxu1  ;;  %v1288_v6 = vpop.permute.xlu1 %1287 }
 0x62b   : > { %v2368_v25 = vpack.c.bf16 %v1252_v7, %v1250_v54  ;;  %v1225_v12 = vpop.f32.mrb[17].mxu1  ;;  %v1224_v16 = vadd.f32 %v1223_v15, %v1092_v13 }
 0x62c   : > { %v2366_v26 = vpack.c.bf16 %v1253_v11, %v1251_v10  ;;  %v1226_v17 = vadd.f32 %v1225_v12, %v1092_v13 }
 0x62d   : > { %v1254_v23 = vmax.f32 %v1224_v16, 0.0 }
 0x62e   : > { %v1229_v9 = vpop.f32.mrb[18].mxu1  ;;  %2367 = vmatprep.subr.bf16.mxu0 %v2366_v26  ;;  %v1255_v28 = vmax.f32 %v1226_v17, 0.0  ;;  %v1399_v17 = vld [vmem:[%s3242_s2 + $0xe0] sm:$0xff] }
 0x62f   : > { %v1230_v19 = vadd.f32 %v1229_v9, %v1097_v8  ;;  %v1231_v21 = vpop.f32.mrb[19].mxu1  ;;  %2369 = vmatpush1.bf16.msra.mxu0 %v2368_v25  ;;  %v1400_v9 = vld [vmem:[%s3242_s2 + $0xe8] sm:$0xff] }
 0x630   : > { %v1232_v22 = vadd.f32 %v1231_v21, %v1097_v8 }
 0x631   : > { %v1256_v27 = vmax.f32 %v1230_v19, 0.0  ;;  %v1406_v19 = vpop.permute.xlu0 %1405 }
 0x632   : > { %v1257_v29 = vmax.f32 %v1232_v22, 0.0  ;;  %v1235_v31 = vpop.f32.mrb[20].mxu1 }
 0x633   : > { %v2372_v33 = vpack.c.bf16 %v1256_v27, %v1254_v23  ;;  %v1237_v34 = vpop.f32.mrb[21].mxu1  ;;  %v1236_v39 = vadd.f32 %v1235_v31, %v1102_v35 }
 0x634   : > { %v2370_v38 = vpack.c.bf16 %v1257_v29, %v1255_v28  ;;  %v1238_v42 = vadd.f32 %v1237_v34, %v1102_v35  ;;  %v1411_v28 = vpop.permute.xlu1 %1410 }
 0x635   : > { %v1258_v47 = vmax.f32 %v1236_v39, 0.0 }
 0x636   : > { %v1241_v43 = vpop.f32.mrb[22].mxu1  ;;  %2371 = vmatprep.subr.bf16.mxu0 %v2370_v38  ;;  %v1259_v41 = vmax.f32 %v1238_v42, 0.0 }
 0x637   : > { %v1242_v44 = vadd.f32 %v1241_v43, %v1107_v40  ;;  %v1243_v45 = vpop.f32.mrb[23].mxu1  ;;  %2373 = vmatpush1.bf16.msra.mxu0 %v2372_v33 }
 0x638   : > { %v1244_v46 = vadd.f32 %v1243_v45, %v1107_v40 }
 0x639   : > { %v1260_v36 = vmax.f32 %v1242_v44, 0.0 }
 0x63a   : > { %v1261_v48 = vmax.f32 %v1244_v46, 0.0 }
 0x63b   : > { %v2376_v49 = vpack.c.bf16 %v1260_v36, %v1258_v47 }
 0x63c   : > { %v2374_v50 = vpack.c.bf16 %v1261_v48, %v1259_v41 }
 0x63e   : > { %2375 = vmatprep.subr.bf16.mxu0 %v2374_v50 }
 0x63f   : > { %2377 = vmatpush1.bf16.msra.mxu0 %v2376_v49 }
 0x642   : > { %2197 = vmatmul.mubr.msk.f32.vlgmr.msra.gmra.mrb[8].mxu0 %vm947_vm2, %v1262_v18 }
 0x643   : > { %1372 = vmatprep.mubr.f32.mxu0 %v2590_v32 }
 0x646   : > { %2198 = vmatmul.mubr.msk.f32.gmra.mrb[10].mxu0 %vm947_vm2, %v1263_v20 }
 0x647   : > { %1378 = vmatprep.mubr.f32.mxu0 %v2590_v32 }
 0x64a   : > { %2199 = vmatmul.mubr.msk.f32.gmra.mrb[12].mxu0 %vm947_vm2, %v1264_v24 }
 0x64b   : > { %1384 = vmatprep.mubr.f32.mxu0 %v2590_v32 }
 0x64e   : > { %2200 = vmatmul.mubr.msk.f32.gmra.mrb[14].mxu0 %vm947_vm2, %v1265_v30 }
 0x64f   : > { %1483 = vmatprep.mubr.f32.mxu0 %v2590_v32 }
 0x715   : > { %v1368_v51 = vpop.f32.mrb[8].mxu0 }
 0x716   : > { %v1370_v52 = vpop.f32.mrb[9].mxu0  ;;  %v1369_v56 = vadd.f32 %v1368_v51, %v1273_v55 }
 0x717   : > { %v1371_v58 = vadd.f32 %v1370_v52, %v1273_v55 }
 0x718   : > { %v1391_v53 = vmax.f32 %v1369_v56, 0.0 }
 0x719   : > { %v1374_v59 = vpop.f32.mrb[10].mxu0  ;;  %v1392_v60 = vmax.f32 %v1371_v58, 0.0 }
 0x71a   : > { %v1375_v62 = vadd.f32 %v1374_v59, %v1278_v57  ;;  %v1376_v63 = vpop.f32.mrb[11].mxu0 }
 0x71b   : > { %v1377_v37 = vadd.f32 %v1376_v63, %v1278_v57 }
 0x71c   : > { %v1393_v0 = vmax.f32 %v1375_v62, 0.0 }
 0x71d   : > { %v1394_v61 = vmax.f32 %v1377_v37, 0.0  ;;  %v1380_v1 = vpop.f32.mrb[12].mxu0 }
 0x71e   : > { %v2380_v3 = vpack.c.bf16 %v1393_v0, %v1391_v53  ;;  %v1382_v2 = vpop.f32.mrb[13].mxu0  ;;  %v1381_v5 = vadd.f32 %v1380_v1, %v1283_v4 }
 0x71f   : > { %v2378_v14 = vpack.c.bf16 %v1394_v61, %v1392_v60  ;;  %v1383_v54 = vadd.f32 %v1382_v2, %v1283_v4 }
 0x720   : > { %v1395_v25 = vmax.f32 %v1381_v5, 0.0 }
 0x721   : > { %v1386_v7 = vpop.f32.mrb[14].mxu0  ;;  %2379 = vmatprep.subr.bf16.mxu0 %v2378_v14  ;;  %v1396_v13 = vmax.f32 %v1383_v54, 0.0 }
 0x722   : > { %v1387_v10 = vadd.f32 %v1386_v7, %v1288_v6  ;;  %v1388_v11 = vpop.f32.mrb[15].mxu0  ;;  %2381 = vmatpush1.bf16.msra.mxu0 %v2380_v3 }
 0x723   : > { %v1389_v15 = vadd.f32 %v1388_v11, %v1288_v6 }
 0x724   : > { %v1397_v12 = vmax.f32 %v1387_v10, 0.0 }
 0x725   : > { %v1398_v26 = vmax.f32 %v1389_v15, 0.0 }
 0x726   : > { %v2384_v16 = vpack.c.bf16 %v1397_v12, %v1395_v25 }
 0x727   : > { %v2382_v8 = vpack.c.bf16 %v1398_v26, %v1396_v13 }
 0x729   : > { %2383 = vmatprep.subr.bf16.mxu0 %v2382_v8 }
 0x72a   : > { %2385 = vmatpush1.bf16.msra.mxu0 %v2384_v16 }
 0x72d   : > { %2201 = vmatmul.mubr.msk.f32.vlgmr.msra.gmra.mrb[16].mxu0 %vm557_vm1, %v1399_v17 }
 0x72e   : > { %1489 = vmatprep.mubr.f32.mxu0 %v2590_v32 }
 0x731   : > { %2202 = vmatmul.mubr.msk.f32.gmra.mrb[18].mxu0 %vm557_vm1, %v1400_v9 }
 0x732   : > { %1720 = vmatprep.mubr.f32.mxu0 %v2590_v32 }
 0x800   : > { %v1485_v21 = vpop.f32.mrb[16].mxu0 }
 0x801   : > { %v1486_v22 = vadd.f32 %v1485_v21, %v1406_v19  ;;  %v1487_v23 = vpop.f32.mrb[17].mxu0 }
 0x802   : > { %v1488_v27 = vadd.f32 %v1487_v23, %v1406_v19 }
 0x803   : > { %1496 = vxpose.xlu0.b32.start [1/2] (short) %v1486_v22, 128 }
 0x804   : > { %v1491_v29 = vpop.f32.mrb[18].mxu0  ;;  %1528 = vxpose.xlu1.b32.start [1/2] (short) %v1488_v27, 128 }
 0x805   : > { %v1492_v31 = vadd.f32 %v1491_v29, %v1411_v28  ;;  %v1493_v33 = vpop.f32.mrb[19].mxu0 }
 0x806   : > { %v1494_v34 = vadd.f32 %v1493_v33, %v1411_v28 }
 0x807   : > { %v2388_v35 = vpack.c.bf16 %v1492_v31, %v1486_v22  ;;  %1497 = vxpose.xlu0.b32.end [2/2] (short) %v1492_v31, 128 }
 0x808   : > { %v2386_v38 = vpack.c.bf16 %v1494_v34, %v1488_v27  ;;  %1529 = vxpose.xlu1.b32.end [2/2] (short) %v1494_v34, 128 }
 0x80a   : > { %2387 = vmatprep.subr.bf16.mxu0 %v2386_v38  ;;  %2390 = vmatprep.subr.bf16.mxu1 %v2386_v38 }
 0x80b   : > { %2389 = vmatpush1.bf16.msra.mxu0 %v2388_v35  ;;  %2391 = vmatpush1.bf16.msra.mxu1 %v2388_v35 }
 0x883   : > { %v1512_v39 = vpop.trf.xlu0 }
 0x884   : > { %2203 = vmatmul.mubr.msk.f32.vlgmr.msra.gmra.mrb[20].mxu0 %vm286_vm0, %v1512_v39  ;;  %v1544_v41 = vpop.trf.xlu1 }
 0x885   : > { %1725 = vmatprep.mubr.f32.mxu0 %v2590_v32 }
 0x887   : > { %v1513_v40 = vpop.trf.xlu0 }
 0x888   : > { %2204 = vmatmul.mubr.msk.f32.gmra.mrb[22].mxu0 %vm286_vm0, %v1513_v40  ;;  %v1545_v49 = vpop.trf.xlu1 }
 0x889   : > { %1730 = vmatprep.mubr.f32.mxu0 %v2590_v32 }
 0x88b   : > { %v1514_v42 = vpop.trf.xlu0 }
 0x88c   : > { %2205 = vmatmul.mubr.msk.f32.gmra.mrb[24].mxu0 %vm286_vm0, %v1514_v42  ;;  %v1546_v20 = vpop.trf.xlu1 }
 0x88d   : > { %1735 = vmatprep.mubr.f32.mxu0 %v2590_v32 }
 0x88f   : > { %v1515_v43 = vpop.trf.xlu0 }
 0x890   : > { %2206 = vmatmul.mubr.msk.f32.gmra.mrb[26].mxu0 %vm286_vm0, %v1515_v43  ;;  %v1547_v30 = vpop.trf.xlu1 }
 0x891   : > { %1740 = vmatprep.mubr.f32.mxu0 %v2590_v32 }
 0x893   : > { %v1516_v44 = vpop.trf.xlu0 }
 0x894   : > { %2207 = vmatmul.mubr.msk.f32.gmra.mrb[28].mxu0 %vm286_vm0, %v1516_v44  ;;  %v1548_v55 = vpop.trf.xlu1 }
 0x895   : > { %1745 = vmatprep.mubr.f32.mxu0 %v2590_v32 }
 0x897   : > { %v1517_v45 = vpop.trf.xlu0 }
 0x898   : > { %2208 = vmatmul.mubr.msk.f32.gmra.mrb[30].mxu0 %vm286_vm0, %v1517_v45  ;;  %v1549_v57 = vpop.trf.xlu1 }
 0x899   : > { %1750 = vmatprep.mubr.f32.mxu0 %v2590_v32 }
 0x89b   : > { %v1518_v46 = vpop.trf.xlu0 }
 0x89c   : > { %2209 = vmatmul.mubr.msk.f32.gmra.mrb[32].mxu0 %vm286_vm0, %v1518_v46  ;;  %v1550_v58 = vpop.trf.xlu1 }
 0x89d   : > { %1755 = vmatprep.mubr.f32.mxu0 %v2590_v32 }
 0x89f   : > { %v1519_v47 = vpop.trf.xlu0 }
 0x8a0   : > { %2210 = vmatmul.mubr.msk.f32.gmra.mrb[34].mxu0 %vm286_vm0, %v1519_v47  ;;  %v1551_v59 = vpop.trf.xlu1 }
 0x8a1   : > { %1760 = vmatprep.mubr.f32.mxu0 %v2590_v32 }
 0x8a3   : > { %v1520_v36 = vpop.trf.xlu0 }
 0x8a4   : > { %2211 = vmatmul.mubr.msk.f32.gmra.mrb[36].mxu0 %vm286_vm0, %v1520_v36  ;;  %v1552_v62 = vpop.trf.xlu1 }
 0x8a5   : > { %1765 = vmatprep.mubr.f32.mxu0 %v2590_v32 }
 0x8a7   : > { %v1521_v48 = vpop.trf.xlu0 }
 0x8a8   : > { %2212 = vmatmul.mubr.msk.f32.gmra.mrb[38].mxu0 %vm286_vm0, %v1521_v48  ;;  %v1553_v63 = vpop.trf.xlu1 }
 0x8a9   : > { %1770 = vmatprep.mubr.f32.mxu0 %v2590_v32 }
 0x8ab   : > { %v1522_v50 = vpop.trf.xlu0 }
 0x8ac   : > { %2213 = vmatmul.mubr.msk.f32.gmra.mrb[40].mxu0 %vm286_vm0, %v1522_v50  ;;  %v1554_v37 = vpop.trf.xlu1 }
 0x8ad   : > { %1775 = vmatprep.mubr.f32.mxu0 %v2590_v32 }
 0x8af   : > { %v1523_v18 = vpop.trf.xlu0 }
 0x8b0   : > { %2214 = vmatmul.mubr.msk.f32.gmra.mrb[42].mxu0 %vm286_vm0, %v1523_v18  ;;  %v1555_v53 = vpop.trf.xlu1 }
 0x8b1   : > { %1780 = vmatprep.mubr.f32.mxu0 %v2590_v32 }
 0x8b3   : > { %v1524_v24 = vpop.trf.xlu0 }
 0x8b4   : > { %2215 = vmatmul.mubr.msk.f32.gmra.mrb[44].mxu0 %vm286_vm0, %v1524_v24  ;;  %v1556_v0 = vpop.trf.xlu1 }
 0x8b5   : > { %1785 = vmatprep.mubr.f32.mxu0 %v2590_v32 }
 0x8b7   : > { %v1525_v51 = vpop.trf.xlu0 }
 0x8b8   : > { %2216 = vmatmul.mubr.msk.f32.gmra.mrb[46].mxu0 %vm286_vm0, %v1525_v51  ;;  %v1557_v60 = vpop.trf.xlu1 }
 0x8b9   : > { %1790 = vmatprep.mubr.f32.mxu0 %v2590_v32 }
 0x8bb   : > { %v1526_v52 = vpop.trf.xlu0 }
 0x8bc   : > { %2217 = vmatmul.mubr.msk.f32.gmra.mrb[48].mxu0 %vm286_vm0, %v1526_v52  ;;  %v1558_v61 = vpop.trf.xlu1 }
 0x8bf   : > { %v1527_v56 = vpop.trf.xlu0 }
 0x8c0   : > { %2218 = vmatmul.mubr.msk.f32.vlgmr.msra.gmra.mrb[24].mxu1 %vm286_vm0, %v1527_v56  ;;  %v1559_v1 = vpop.trf.xlu1 }
 0x8c1   : > { %1800 = vmatprep.mubr.f32.mxu1 %v2590_v32 }
 0x8c4   : > { %2219 = vmatmul.mubr.msk.f32.gmra.mrb[26].mxu1 %vm286_vm0, %v1544_v41 }
 0x8c5   : > { %1805 = vmatprep.mubr.f32.mxu1 %v2590_v32 }
 0x8c8   : > { %2220 = vmatmul.mubr.msk.f32.gmra.mrb[28].mxu1 %vm286_vm0, %v1545_v49 }
 0x8c9   : > { %1810 = vmatprep.mubr.f32.mxu1 %v2590_v32 }
 0x8cc   : > { %2221 = vmatmul.mubr.msk.f32.gmra.mrb[30].mxu1 %vm286_vm0, %v1546_v20 }
 0x8cd   : > { %1815 = vmatprep.mubr.f32.mxu1 %v2590_v32 }
 0x8d0   : > { %2222 = vmatmul.mubr.msk.f32.gmra.mrb[32].mxu1 %vm286_vm0, %v1547_v30 }
 0x8d1   : > { %1820 = vmatprep.mubr.f32.mxu1 %v2590_v32 }
 0x8d4   : > { %2223 = vmatmul.mubr.msk.f32.gmra.mrb[34].mxu1 %vm286_vm0, %v1548_v55 }
 0x8d5   : > { %1825 = vmatprep.mubr.f32.mxu1 %v2590_v32 }
 0x8d8   : > { %2224 = vmatmul.mubr.msk.f32.gmra.mrb[36].mxu1 %vm286_vm0, %v1549_v57 }
 0x8d9   : > { %1830 = vmatprep.mubr.f32.mxu1 %v2590_v32 }
 0x8dc   : > { %2225 = vmatmul.mubr.msk.f32.gmra.mrb[38].mxu1 %vm286_vm0, %v1550_v58 }
 0x8dd   : > { %1835 = vmatprep.mubr.f32.mxu1 %v2590_v32 }
 0x8e0   : > { %2226 = vmatmul.mubr.msk.f32.gmra.mrb[40].mxu1 %vm286_vm0, %v1551_v59 }
 0x8e1   : > { %1840 = vmatprep.mubr.f32.mxu1 %v2590_v32 }
 0x8e4   : > { %2227 = vmatmul.mubr.msk.f32.gmra.mrb[42].mxu1 %vm286_vm0, %v1552_v62 }
 0x8e5   : > { %1845 = vmatprep.mubr.f32.mxu1 %v2590_v32 }
 0x8e8   : > { %2228 = vmatmul.mubr.msk.f32.gmra.mrb[44].mxu1 %vm286_vm0, %v1553_v63 }
 0x8e9   : > { %1850 = vmatprep.mubr.f32.mxu1 %v2590_v32 }
 0x8ec   : > { %2229 = vmatmul.mubr.msk.f32.gmra.mrb[46].mxu1 %vm286_vm0, %v1554_v37 }
 0x8ed   : > { %1855 = vmatprep.mubr.f32.mxu1 %v2590_v32 }
 0x8f0   : > { %2230 = vmatmul.mubr.msk.f32.gmra.mrb[48].mxu1 %vm286_vm0, %v1555_v53 }
 0x8f1   : > { %1860 = vmatprep.mubr.f32.mxu1 %v2590_v32 }
 0x8f4   : > { %2231 = vmatmul.mubr.msk.f32.gmra.mrb[50].mxu1 %vm286_vm0, %v1556_v0 }
 0x8f5   : > { %1865 = vmatprep.mubr.f32.mxu1 %v2590_v32 }
 0x8f8   : > { %2232 = vmatmul.mubr.msk.f32.gmra.mrb[52].mxu1 %vm286_vm0, %v1557_v60 }
 0x8f9   : > { %1870 = vmatprep.mubr.f32.mxu1 %v2590_v32 }
 0x8fc   : > { %2233 = vmatmul.mubr.msk.f32.gmra.mrb[54].mxu1 %vm286_vm0, %v1558_v61 }
 0x8fd   : > { %1875 = vmatprep.mubr.f32.mxu1 %v2590_v32 }
 0x900   : > { %2234 = vmatmul.mubr.msk.f32.gmra.mrb[56].mxu1 %vm286_vm0, %v1559_v1 }
 0x957   : > { %v1722_v3 = vpop.f32.mrb[20].mxu0 }
 0x958   : > { %v1881_v2 = vmul.f32 0.5, %v1722_v3  ;;  %v1724_v4 = vpop.f32.mrb[21].mxu0 }
 0x95a   : > { %2461 = vtanh.f32 %v1881_v2 }
 0x95b   : > { %v1727_v14 = vpop.f32.mrb[22].mxu0 }
 0x95c   : > { %v1883_v5 = vmul.f32 0.5, %v1727_v14  ;;  %v1729_v6 = vpop.f32.mrb[23].mxu0 }
 0x95e   : > { %2463 = vtanh.f32 %v1883_v5 }
 0x95f   : > { %v1732_v54 = vpop.f32.mrb[24].mxu0 }
 0x960   : > { %v1885_v7 = vmul.f32 0.5, %v1732_v54  ;;  %v1734_v10 = vpop.f32.mrb[25].mxu0 }
 0x962   : > { %2465 = vtanh.f32 %v1885_v7 }
 0x963   : > { %v1737_v32 = vpop.f32.mrb[26].mxu0 }
 0x964   : > { %v2462_v11 = vpop.eup %2461  ;;  %v1887_v15 = vmul.f32 0.5, %v1737_v32  ;;  %v1739_v25 = vpop.f32.mrb[27].mxu0 }
 0x965   : > { %v1945_v12 = vmul.f32 0.5, %v2462_v11 }
 0x966   : > { %2467 = vtanh.f32 %v1887_v15 }
 0x967   : > { %v1977_v13 = vadd.f32 0.5, %v1945_v12  ;;  %v1742_v26 = vpop.f32.mrb[28].mxu0 }
 0x968   : > { %2538 = shalt.err (!%p2535_p3)
}
 0x969   : > { %s2539_s15 = scalar_lea.hbm %s3158_s14, 512  ;;  %s2543_s10 = scalar_lea.hbm %s3244_s4, 2048 }
 0x96a   : > { %p2540_p4 = scmp.ne.s32.totalorder %s3158_s14, %s2539_s15  ;;  %p2544_p9 = scmp.lt.u32.totalorder %s3158_s14, %s3244_s4 }
 0x96b   : > { %p2545_p10 = scmp.lt.u32.totalorder %s2543_s10, %s2539_s15  ;;  %p2547_p12 = scmp.lt.u32.totalorder %s2539_s15, %s3158_s14 }
 0x96c   : > { %p2541_p7 = pnand %p2540_p4, %p2662_p5 }
 0x96d   : > { %p2546_p11 = por %p2545_p10, %p2544_p9 }
 0x96e   : > { %p2542_p8 = pneg %p2541_p7 }
 0x96f   : > { %p2548_p13 = por %p2547_p12, %p2546_p11 }
 0x971   : > { %p2549_p0 = pnand %p2548_p13, %p2542_p8 }
 0x973   : > { %2552 = shalt.err (!%p2549_p0)
}
 0x974   : > { %s2592_s13 = smov 128   ;;  %s2593_s30 = smov 8   ;;  %v2464_v16 = vpop.eup %2463  ;;  %v1889_v8 = vmul.f32 0.5, %v1742_v26  ;;  %v1744_v17 = vpop.f32.mrb[29].mxu0  ;;  %2009 = vst [vmem:[%s3163_s9] sm:$0xff] %v1977_v13 }
 0x975   : > { %2392 = dma.vmem_to_hbm [thread:$0]  (%p2662_p5), %s3152_s8, 512, %s3158_s14, %s3167_s17, %s2592_s13, %s2592_s13, %s2593_s30   ;;  %v1947_v9 = vmul.f32 0.5, %v2464_v16  ;;  %v1747_v21 = vpop.f32.mrb[30].mxu0  ;;  %v2466_v22 = vpop.eup %2465 }
 0x976   : > { %2469 = vtanh.f32 %v1889_v8  ;;  %v1891_v23 = vmul.f32 0.5, %v1747_v21  ;;  %v1749_v27 = vpop.f32.mrb[31].mxu0  ;;  %v1949_v28 = vmul.f32 0.5, %v2466_v22  ;;  %v2468_v33 = vpop.eup %2467 }
 0x977   : > { %v1979_v19 = vadd.f32 0.5, %v1947_v9  ;;  %v1752_v31 = vpop.f32.mrb[32].mxu0  ;;  %v1951_v38 = vmul.f32 0.5, %v2468_v33 }
 0x978   : > { %2471 = vtanh.f32 %v1891_v23  ;;  %v1981_v29 = vadd.f32 0.5, %v1949_v28  ;;  %v1893_v34 = vmul.f32 0.5, %v1752_v31  ;;  %v1754_v35 = vpop.f32.mrb[33].mxu0 }
 0x979   : > { %2011 = vst [vmem:[%s3163_s9 + $0x10] sm:$0xff] %v1979_v19  ;;  %v1983_v39 = vadd.f32 0.5, %v1951_v38  ;;  %v1757_v40 = vpop.f32.mrb[34].mxu0 }
 0x97a   : > { %2013 = vst [vmem:[%s3163_s9 + $0x20] sm:$0xff] %v1981_v29  ;;  %2473 = vtanh.f32 %v1893_v34  ;;  %v1895_v43 = vmul.f32 0.5, %v1757_v40  ;;  %v1759_v44 = vpop.f32.mrb[35].mxu0 }
 0x97b   : > { %2015 = vst [vmem:[%s3163_s9 + $0x30] sm:$0xff] %v1983_v39  ;;  %v1762_v47 = vpop.f32.mrb[36].mxu0 }
 0x97c   : > { %2475 = vtanh.f32 %v1895_v43  ;;  %v1897_v41 = vmul.f32 0.5, %v1762_v47  ;;  %v1764_v48 = vpop.f32.mrb[37].mxu0 }
 0x97d   : > { %v1767_v18 = vpop.f32.mrb[38].mxu0 }
 0x97e   : > { %2477 = vtanh.f32 %v1897_v41  ;;  %v1899_v24 = vmul.f32 0.5, %v1767_v18  ;;  %v1769_v30 = vpop.f32.mrb[39].mxu0 }
 0x97f   : > { %v1772_v55 = vpop.f32.mrb[40].mxu0 }
 0x980   : > { %v2470_v42 = vpop.eup %2469  ;;  %2479 = vtanh.f32 %v1899_v24  ;;  %v1901_v57 = vmul.f32 0.5, %v1772_v55  ;;  %v1774_v58 = vpop.f32.mrb[41].mxu0 }
 0x981   : > { %v1953_v45 = vmul.f32 0.5, %v2470_v42 }
 0x982   : > { %v2472_v36 = vpop.eup %2471  ;;  %2481 = vtanh.f32 %v1901_v57 }
 0x983   : > { %v1985_v46 = vadd.f32 0.5, %v1953_v45  ;;  %v1955_v49 = vmul.f32 0.5, %v2472_v36  ;;  %v1777_v63 = vpop.f32.mrb[42].mxu0 }
 0x984   : > { %v2474_v20 = vpop.eup %2473  ;;  %v1903_v53 = vmul.f32 0.5, %v1777_v63  ;;  %v1779_v0 = vpop.f32.mrb[43].mxu0 }
 0x985   : > { %2017 = vst [vmem:[%s3163_s9 + $0x40] sm:$0xff] %v1985_v46  ;;  %v1987_v50 = vadd.f32 0.5, %v1955_v49  ;;  %v1957_v51 = vmul.f32 0.5, %v2474_v20 }
 0x986   : > { %v2476_v56 = vpop.eup %2475  ;;  %2483 = vtanh.f32 %v1903_v53 }
 0x987   : > { %2019 = vst [vmem:[%s3163_s9 + $0x50] sm:$0xff] %v1987_v50  ;;  %v1989_v52 = vadd.f32 0.5, %v1957_v51  ;;  %v1959_v59 = vmul.f32 0.5, %v2476_v56  ;;  %v1782_v1 = vpop.f32.mrb[44].mxu0 }
 0x988   : > { %v2478_v37 = vpop.eup %2477  ;;  %v1905_v2 = vmul.f32 0.5, %v1782_v1  ;;  %v1784_v4 = vpop.f32.mrb[45].mxu0 }
 0x989   : > { %2021 = vst [vmem:[%s3163_s9 + $0x60] sm:$0xff] %v1989_v52  ;;  %v1991_v62 = vadd.f32 0.5, %v1959_v59  ;;  %v1961_v60 = vmul.f32 0.5, %v2478_v37 }
 0x98a   : > { %v2480_v3 = vpop.eup %2479  ;;  %2485 = vtanh.f32 %v1905_v2 }
 0x98b   : > { %2023 = vst [vmem:[%s3163_s9 + $0x70] sm:$0xff] %v1991_v62  ;;  %v1993_v61 = vadd.f32 0.5, %v1961_v60  ;;  %v1963_v14 = vmul.f32 0.5, %v2480_v3  ;;  %v1787_v6 = vpop.f32.mrb[46].mxu0 }
 0x98c   : > { %v2482_v54 = vpop.eup %2481  ;;  %v1907_v7 = vmul.f32 0.5, %v1787_v6  ;;  %v1789_v10 = vpop.f32.mrb[47].mxu0 }
 0x98d   : > { %2025 = vst [vmem:[%s3163_s9 + $0x80] sm:$0xff] %v1993_v61  ;;  %v1995_v5 = vadd.f32 0.5, %v1963_v14  ;;  %v1965_v32 = vmul.f32 0.5, %v2482_v54 }
 0x98e   : > { %2487 = vtanh.f32 %v1907_v7 }
 0x98f   : > { %2027 = vst [vmem:[%s3163_s9 + $0x90] sm:$0xff] %v1995_v5  ;;  %v1997_v11 = vadd.f32 0.5, %v1965_v32  ;;  %v1792_v15 = vpop.f32.mrb[48].mxu0 }
 0x990   : > { %v2484_v25 = vpop.eup %2483  ;;  %v1909_v12 = vmul.f32 0.5, %v1792_v15  ;;  %v1794_v13 = vpop.f32.mrb[49].mxu0 }
 0x991   : > { %2029 = vst [vmem:[%s3163_s9 + $0xa0] sm:$0xff] %v1997_v11  ;;  %v1967_v26 = vmul.f32 0.5, %v2484_v25 }
 0x992   : > { %2489 = vtanh.f32 %v1909_v12 }
 0x993   : > { %v1999_v16 = vadd.f32 0.5, %v1967_v26  ;;  %v1797_v8 = vpop.f32.mrb[24].mxu1 }
 0x994   : > { %v2486_v17 = vpop.eup %2485  ;;  %v1911_v9 = vmul.f32 0.5, %v1797_v8  ;;  %v1799_v19 = vpop.f32.mrb[25].mxu1 }
 0x995   : > { %2031 = vst [vmem:[%s3163_s9 + $0xb0] sm:$0xff] %v1999_v16  ;;  %v1969_v21 = vmul.f32 0.5, %v2486_v17 }
 0x996   : > { %2491 = vtanh.f32 %v1911_v9 }
 0x997   : > { %v2001_v22 = vadd.f32 0.5, %v1969_v21  ;;  %v1802_v23 = vpop.f32.mrb[26].mxu1 }
 0x998   : > { %v2488_v27 = vpop.eup %2487  ;;  %v1803_v28 = vpop.f32.mrb[27].mxu1 }
 0x999   : > { %2033 = vst [vmem:[%s3163_s9 + $0xc0] sm:$0xff] %v2001_v22  ;;  %v1971_v29 = vmul.f32 0.5, %v2488_v27  ;;  %v1882_v31 = vmul.f32 0.5, %v1803_v28 }
 0x99b   : > { %v2003_v33 = vadd.f32 0.5, %v1971_v29  ;;  %2493 = vtanh.f32 %v1882_v31  ;;  %v1807_v34 = vpop.f32.mrb[28].mxu1 }
 0x99c   : > { %v2490_v35 = vpop.eup %2489  ;;  %v1808_v38 = vpop.f32.mrb[29].mxu1 }
 0x99d   : > { %2035 = vst [vmem:[%s3163_s9 + $0xd0] sm:$0xff] %v2003_v33  ;;  %v1973_v39 = vmul.f32 0.5, %v2490_v35  ;;  %v1884_v40 = vmul.f32 0.5, %v1808_v38 }
 0x99f   : > { %v2005_v42 = vadd.f32 0.5, %v1973_v39  ;;  %2495 = vtanh.f32 %v1884_v40  ;;  %v1812_v43 = vpop.f32.mrb[30].mxu1 }
 0x9a0   : > { %v2492_v44 = vpop.eup %2491  ;;  %v1813_v45 = vpop.f32.mrb[31].mxu1 }
 0x9a1   : > { %2037 = vst [vmem:[%s3163_s9 + $0xe0] sm:$0xff] %v2005_v42  ;;  %v1975_v46 = vmul.f32 0.5, %v2492_v44  ;;  %v1886_v47 = vmul.f32 0.5, %v1813_v45 }
 0x9a3   : > { %v2007_v36 = vadd.f32 0.5, %v1975_v46  ;;  %2497 = vtanh.f32 %v1886_v47  ;;  %v1817_v41 = vpop.f32.mrb[32].mxu1 }
 0x9a4   : > { %v1818_v48 = vpop.f32.mrb[33].mxu1 }
 0x9a5   : > { %v2494_v49 = vpop.eup %2493  ;;  %2039 = vst [vmem:[%s3163_s9 + $0xf0] sm:$0xff] %v2007_v36  ;;  %v1888_v50 = vmul.f32 0.5, %v1818_v48 }
 0x9a6   : > { %v1946_v18 = vmul.f32 0.5, %v2494_v49 }
 0x9a7   : > { %2499 = vtanh.f32 %v1888_v50  ;;  %v1822_v20 = vpop.f32.mrb[34].mxu1 }
 0x9a8   : > { %v1978_v24 = vadd.f32 0.5, %v1946_v18  ;;  %v1823_v30 = vpop.f32.mrb[35].mxu1 }
 0x9a9   : > { %v2496_v51 = vpop.eup %2495  ;;  %v1890_v52 = vmul.f32 0.5, %v1823_v30 }
 0x9aa   : > { %2010 = vst [vmem:[%s3163_s9 + $0x8] sm:$0xff] %v1978_v24  ;;  %v1948_v55 = vmul.f32 0.5, %v2496_v51 }
 0x9ab   : > { %2501 = vtanh.f32 %v1890_v52  ;;  %v1827_v56 = vpop.f32.mrb[36].mxu1 }
 0x9ac   : > { %v1980_v57 = vadd.f32 0.5, %v1948_v55  ;;  %v1828_v58 = vpop.f32.mrb[37].mxu1 }
 0x9ad   : > { %v2498_v59 = vpop.eup %2497  ;;  %v1892_v62 = vmul.f32 0.5, %v1828_v58 }
 0x9ae   : > { %2012 = vst [vmem:[%s3163_s9 + $0x18] sm:$0xff] %v1980_v57  ;;  %v1950_v63 = vmul.f32 0.5, %v2498_v59 }
 0x9af   : > { %2503 = vtanh.f32 %v1892_v62  ;;  %v1832_v37 = vpop.f32.mrb[38].mxu1 }
 0x9b0   : > { %v1982_v53 = vadd.f32 0.5, %v1950_v63  ;;  %v1833_v0 = vpop.f32.mrb[39].mxu1 }
 0x9b1   : > { %v2500_v60 = vpop.eup %2499  ;;  %v1894_v61 = vmul.f32 0.5, %v1833_v0 }
 0x9b2   : > { %2014 = vst [vmem:[%s3163_s9 + $0x28] sm:$0xff] %v1982_v53  ;;  %v1952_v1 = vmul.f32 0.5, %v2500_v60 }
 0x9b3   : > { %2505 = vtanh.f32 %v1894_v61  ;;  %v1837_v3 = vpop.f32.mrb[40].mxu1 }
 0x9b4   : > { %v1984_v2 = vadd.f32 0.5, %v1952_v1  ;;  %v1838_v4 = vpop.f32.mrb[41].mxu1 }
 0x9b5   : > { %v2502_v14 = vpop.eup %2501  ;;  %v1896_v5 = vmul.f32 0.5, %v1838_v4 }
 0x9b6   : > { %2016 = vst [vmem:[%s3163_s9 + $0x38] sm:$0xff] %v1984_v2  ;;  %v1954_v6 = vmul.f32 0.5, %v2502_v14 }
 0x9b7   : > { %2507 = vtanh.f32 %v1896_v5  ;;  %v1842_v54 = vpop.f32.mrb[42].mxu1 }
 0x9b8   : > { %v1986_v7 = vadd.f32 0.5, %v1954_v6  ;;  %v1843_v10 = vpop.f32.mrb[43].mxu1 }
 0x9b9   : > { %v2504_v32 = vpop.eup %2503  ;;  %v1898_v11 = vmul.f32 0.5, %v1843_v10 }
 0x9ba   : > { %2018 = vst [vmem:[%s3163_s9 + $0x48] sm:$0xff] %v1986_v7  ;;  %v1956_v15 = vmul.f32 0.5, %v2504_v32 }
 0x9bb   : > { %2509 = vtanh.f32 %v1898_v11  ;;  %v1847_v25 = vpop.f32.mrb[44].mxu1 }
 0x9bc   : > { %v1988_v12 = vadd.f32 0.5, %v1956_v15  ;;  %v1848_v13 = vpop.f32.mrb[45].mxu1 }
 0x9bd   : > { %v2506_v26 = vpop.eup %2505  ;;  %v1900_v16 = vmul.f32 0.5, %v1848_v13 }
 0x9be   : > { %2020 = vst [vmem:[%s3163_s9 + $0x58] sm:$0xff] %v1988_v12  ;;  %v1958_v8 = vmul.f32 0.5, %v2506_v26 }
 0x9bf   : > { %2511 = vtanh.f32 %v1900_v16  ;;  %v1852_v17 = vpop.f32.mrb[46].mxu1 }
 0x9c0   : > { %v1990_v9 = vadd.f32 0.5, %v1958_v8  ;;  %v1853_v19 = vpop.f32.mrb[47].mxu1 }
 0x9c1   : > { %v2508_v21 = vpop.eup %2507  ;;  %v1902_v22 = vmul.f32 0.5, %v1853_v19 }
 0x9c2   : > { %2022 = vst [vmem:[%s3163_s9 + $0x68] sm:$0xff] %v1990_v9  ;;  %v1960_v23 = vmul.f32 0.5, %v2508_v21 }
 0x9c3   : > { %2513 = vtanh.f32 %v1902_v22  ;;  %v1857_v27 = vpop.f32.mrb[48].mxu1 }
 0x9c4   : > { %v1992_v28 = vadd.f32 0.5, %v1960_v23  ;;  %v1858_v29 = vpop.f32.mrb[49].mxu1 }
 0x9c5   : > { %v2510_v31 = vpop.eup %2509  ;;  %v1904_v33 = vmul.f32 0.5, %v1858_v29 }
 0x9c6   : > { %2024 = vst [vmem:[%s3163_s9 + $0x78] sm:$0xff] %v1992_v28  ;;  %v1962_v34 = vmul.f32 0.5, %v2510_v31 }
 0x9c7   : > { %2515 = vtanh.f32 %v1904_v33  ;;  %v1862_v35 = vpop.f32.mrb[50].mxu1 }
 0x9c8   : > { %v1994_v38 = vadd.f32 0.5, %v1962_v34  ;;  %v1863_v39 = vpop.f32.mrb[51].mxu1 }
 0x9c9   : > { %v2512_v40 = vpop.eup %2511  ;;  %v1906_v42 = vmul.f32 0.5, %v1863_v39 }
 0x9ca   : > { %2026 = vst [vmem:[%s3163_s9 + $0x88] sm:$0xff] %v1994_v38  ;;  %v1964_v43 = vmul.f32 0.5, %v2512_v40 }
 0x9cb   : > { %2517 = vtanh.f32 %v1906_v42  ;;  %v1867_v44 = vpop.f32.mrb[52].mxu1 }
 0x9cc   : > { %v1996_v45 = vadd.f32 0.5, %v1964_v43  ;;  %v1868_v46 = vpop.f32.mrb[53].mxu1 }
 0x9cd   : > { %v2514_v47 = vpop.eup %2513  ;;  %v1908_v36 = vmul.f32 0.5, %v1868_v46 }
 0x9ce   : > { %2028 = vst [vmem:[%s3163_s9 + $0x98] sm:$0xff] %v1996_v45  ;;  %v1966_v41 = vmul.f32 0.5, %v2514_v47 }
 0x9cf   : > { %2519 = vtanh.f32 %v1908_v36  ;;  %v1872_v48 = vpop.f32.mrb[54].mxu1 }
 0x9d0   : > { %v1998_v49 = vadd.f32 0.5, %v1966_v41  ;;  %v1873_v50 = vpop.f32.mrb[55].mxu1 }
 0x9d1   : > { %v2516_v18 = vpop.eup %2515  ;;  %v1910_v20 = vmul.f32 0.5, %v1873_v50 }
 0x9d2   : > { %2030 = vst [vmem:[%s3163_s9 + $0xa8] sm:$0xff] %v1998_v49  ;;  %v1968_v24 = vmul.f32 0.5, %v2516_v18 }
 0x9d3   : > { %2521 = vtanh.f32 %v1910_v20  ;;  %v1877_v30 = vpop.f32.mrb[56].mxu1 }
 0x9d4   : > { %v2000_v51 = vadd.f32 0.5, %v1968_v24  ;;  %v1878_v52 = vpop.f32.mrb[57].mxu1 }
 0x9d5   : > { %v2518_v55 = vpop.eup %2517  ;;  %v1912_v56 = vmul.f32 0.5, %v1878_v52 }
 0x9d6   : > { %2032 = vst [vmem:[%s3163_s9 + $0xb8] sm:$0xff] %v2000_v51  ;;  %v1970_v57 = vmul.f32 0.5, %v2518_v55 }
 0x9d7   : > { %2523 = vtanh.f32 %v1912_v56 }
 0x9d8   : > { %v2002_v58 = vadd.f32 0.5, %v1970_v57 }
 0x9d9   : > { %v2520_v59 = vpop.eup %2519 }
 0x9da   : > { %2034 = vst [vmem:[%s3163_s9 + $0xc8] sm:$0xff] %v2002_v58  ;;  %v1972_v62 = vmul.f32 0.5, %v2520_v59 }
 0x9dc   : > { %v2004_v63 = vadd.f32 0.5, %v1972_v62 }
 0x9dd   : > { %v2522_v37 = vpop.eup %2521 }
 0x9de   : > { %2036 = vst [vmem:[%s3163_s9 + $0xd8] sm:$0xff] %v2004_v63  ;;  %v1974_v53 = vmul.f32 0.5, %v2522_v37 }
 0x9e0   : > { %v2006_v0 = vadd.f32 0.5, %v1974_v53 }
 0x9e1   : > { %v2524_v60 = vpop.eup %2523 }
 0x9e2   : > { %2038 = vst [vmem:[%s3163_s9 + $0xe8] sm:$0xff] %v2006_v0  ;;  %v1976_v61 = vmul.f32 0.5, %v2524_v60 }
 0x9e4   : > { %v2008_v1 = vadd.f32 0.5, %v1976_v61 }
 0x9e6   : > { %2040 = vst [vmem:[%s3163_s9 + $0xf8] sm:$0xff] %v2008_v1 }
 0x9e7 PF: > { %p2398_p5 = scmp.ge.s32.totalorder %s2587_s21, 2  ;;  %s2078_s28 = sand.u32 1, %s2575_s18  }
 0x9e8   : > { %s2079_s8 = scalar_lea.sflag [#allocation3], %s2078_s28 }
 0x9e9   : > { %p2395_p1 = pnand %p2398_p5, %p2666_p6 }
 0x9eb   : > { %2570 = dma.done.wait (!%p2395_p1), %s2079_s8, 512  }
 0x9ec   : > { %2572 = vsyncadd (!%p2395_p1), %s2079_s8, 4294966784  ;;  %p16_p2 = scmp.ge.s32.totalorder %s2649_s24, 6   ;;  %s3248_s18 = smov %s2579_s19 }
 0x9ed   : > { %s3249_s19 = smov %s2583_s20  ;;  %s3250_s20 = smov %s2660_s27 }
 0x9ee   : > { %s3251_s21 = smov %s2649_s24  ;;  %18 = sbr.rel (!%p16_p2) target bundleno = 3 (0x3), region = 86 }
 0x9f5   :  { %2092 = vsyncpa [#allocation3], 1 }
 0x9f6   :  { %2094 = vsyncpa [#allocation3 + $0x1], 1 }

</bundles_post_ra>
